<compile_context>
chip_gen: v5e
topology: v5e:2x2
jax: 0.10.0
libtpu: 0.0.40
codegen_flags: <defaults>
</compile_context>

<pallas_src>
import functools

import jax
import jax.numpy as jnp
import numpy as np
from jax.experimental import pallas as pl
from jax.experimental.pallas import tpu as pltpu


PATCH = 32          # ViT-B/32 patch size
WIDTH_V = 128       # (synthetic) vision width
WIDTH_T = 64        # (synthetic) text width
EMBED_D = 128       # joint embedding dim
VOCAB = 64
LOGIT_SCALE = 100.0
UPSAMPLE = 7        # Upsample(scale_factor=7)


# -----------------------------------------------------------------------------
# Resampling matrix: upsample(x7) + avgpool(S//32) is  M @ x @ M^T  with
# M (224, S); the subsequent 32x32 patchify + mean over the 7x7 patch grid is
# another row/col average, so both fold into Mr (32, S):
#   Mr[p, k] = (1/7) * sum_{g=0..6} M[32*g + p, k]
#   mean_patch = Mr @ x @ Mr^T            (exact, all-linear)
# -----------------------------------------------------------------------------
def _patch_mean_matrix(S):
    assert S % PATCH == 0, "stylegan_size must be a multiple of 32"
    k = S // PATCH                               # AvgPool2d kernel size
    h_out = (UPSAMPLE * S) // k                  # 224
    M = np.zeros((h_out, S), dtype=np.float32)
    for i in range(h_out):
        for p in range(k * i, k * i + k):
            M[i, p // UPSAMPLE] += 1.0 / k
    n_grid = h_out // PATCH                      # 7
    Mr = M.reshape(n_grid, PATCH, S).mean(axis=0)        # (32, S)
    return jnp.asarray(Mr, dtype=jnp.float32)


def _vmem_capacity_bytes():
    try:
        return int(pltpu.get_tpu_info().vmem_capacity_bytes)
    except Exception:                            # pragma: no cover
        return 64 << 20                          # conservative (v7x-sized)


def _planes_per_step(n_planes, S, itemsize, budget_bytes):
    """Largest plane batch whose double-buffered input block fits the budget,
    capped so the grid keeps >= 2 steps (v7x megacore) and divides B*C."""
    max_p = max(1, budget_bytes // (2 * S * S * itemsize))
    p_cap = max(1, n_planes // 2)                # keep at least 2 grid steps
    p = int(min(n_planes, max_p, p_cap, 16))
    while n_planes % p:
        p -= 1
    return p


# -----------------------------------------------------------------------------
# Kernel A: fused upsample + avgpool + patchify + patch-mean.
# One grid step processes P image planes.
# -----------------------------------------------------------------------------
def _resample_patch_mean_kernel(x_ref, mr_ref, mrt_ref, o_ref, t_ref, *,
                                planes_per_step, S):
    P = planes_per_step
    # Matmul 1: all P planes stream through the MXU against the constant
    # (S, 32) RHS (Mr^T stays resident as MXU weights across planes and steps):
    #   t = [x_0; ...; x_{P-1}] @ Mr^T          -> (P*S, 32), f32 accumulation.
    # The (P, S, S) -> (P*S, S) collapse is layout-free (S % 32 == 0).
    x = x_ref[...].astype(jnp.bfloat16).reshape(P * S, S)
    t_ref[...] = jnp.dot(
        x, mrt_ref[...], preferred_element_type=jnp.float32
    ).astype(jnp.bfloat16)

    mr = mr_ref[...]                             # (32, S) bf16
    # Matmul 2 (tiny): out_p = Mr @ t_p.  fori_loop + dynamic ref slices keep
    # only one plane's temporaries live at a time (bounded live ranges).
    # NOTE: last-dim-32 output stores are masked (vst.msk); profile-guided
    # lane-densification is possible but the output is tiny and hidden under
    # the input DMA.
    def body(p, carry):
        start = pl.multiple_of(p * S, S)
        tp = t_ref[pl.ds(start, S), :]           # (S, 32) bf16
        o_ref[p] = jnp.dot(mr, tp, preferred_element_type=jnp.float32)
        return carry

    jax.lax.fori_loop(0, P, body, 0, unroll=True)


def upsample_avgpool_patch_mean(image):
    """image: (B, C, S, S) -> per-plane mean 32x32 patch, (B*C, 32, 32) f32."""
    B, C, S, _ = image.shape
    mr = _patch_mean_matrix(S)
    mr_b = mr.astype(jnp.bfloat16)               # (32, S)
    mrt_b = mr.T.astype(jnp.bfloat16)            # (S, 32)

    n_planes = B * C
    itemsize = jnp.dtype(image.dtype).itemsize
    vmem_cap = _vmem_capacity_bytes()
    # Generation-aware input-block budget: ~40 MiB on 128 MiB parts (v5e/v6e),
    # ~21 MiB on 64 MiB parts (v7x).
    budget = min(vmem_cap // 3, 40 << 20)
    P = _planes_per_step(n_planes, S, itemsize, budget)
    planes = image.reshape(n_planes, S, S)

    vmem_bytes = int(
        2 * P * S * S * itemsize                 # double-buffered input block
        + 2 * P * PATCH * PATCH * 4              # double-buffered output block
        + 2 * 2 * PATCH * S * 2                  # Mr / Mr^T (bf16), double-buf
        + P * S * PATCH * (2 + 4)                # t scratch (bf16) + f32 result
        + (P * S * S * 2 if itemsize == 4 else 0)  # in-kernel bf16 copy of x
        + (8 << 20))                             # headroom
    vmem_bytes = min(max(vmem_bytes, 32 << 20), int(0.9 * vmem_cap))

    out = pl.pallas_call(
        functools.partial(_resample_patch_mean_kernel,
                          planes_per_step=P, S=S),
        out_shape=jax.ShapeDtypeStruct((n_planes, PATCH, PATCH), jnp.float32),
        grid=(n_planes // P,),
        in_specs=[
            pl.BlockSpec((P, S, S), lambda i: (i, 0, 0)),
            pl.BlockSpec((PATCH, S), lambda i: (0, 0)),
            pl.BlockSpec((S, PATCH), lambda i: (0, 0)),
        ],
        out_specs=pl.BlockSpec((P, PATCH, PATCH), lambda i: (i, 0, 0)),
        scratch_shapes=[pltpu.VMEM((P * S, PATCH), jnp.bfloat16)],
        compiler_params=pltpu.CompilerParams(
            dimension_semantics=("parallel",),
            vmem_limit_bytes=vmem_bytes),
    )(planes, mr_b, mrt_b)
    return out                                   # (B*C, 32, 32)


# -----------------------------------------------------------------------------
# Kernel B: fused CLIP head -- patch-embed matmul, image projection, text
# projection, L2 normalization, cosine logits (dot_general contracting the
# last dims, no materialized transpose) and  similarity = 1 - logits/100
# (logit_scale/100 folded at trace time).  One pallas_call; every operand
# (<2 MiB total) sits in VMEM, no intermediate HBM round trips.
# -----------------------------------------------------------------------------
def _clip_head_kernel(mp_ref, wp_ref, wip_ref, tf_ref, wtp_ref, o_ref, *,
                      scale_over_100):
    # Image branch (mean-pool commuted in front, so operands are (B, C*1024)).
    img_feat = jnp.dot(mp_ref[...], wp_ref[...],
                       preferred_element_type=jnp.float32)          # (B, WV)
    img_emb = jnp.dot(img_feat, wip_ref[...],
                      preferred_element_type=jnp.float32)           # (B, D)
    # Text branch projection.
    txt_emb = jnp.dot(tf_ref[...], wtp_ref[...],
                      preferred_element_type=jnp.float32)           # (B, D)
    # L2 normalize.  TODO(synk): no epsilon (matches CLIP); an all-zero
    # embedding row would produce inf/NaN, same as the reference.
    img_n = img_emb * jax.lax.rsqrt(
        jnp.sum(img_emb * img_emb, axis=-1, keepdims=True))
    txt_n = txt_emb * jax.lax.rsqrt(
        jnp.sum(txt_emb * txt_emb, axis=-1, keepdims=True))
    logits = jax.lax.dot_general(
        img_n, txt_n,
        dimension_numbers=(((1,), (1,)), ((), ())),
        preferred_element_type=jnp.float32)                         # (B, B)
    o_ref[...] = 1.0 - scale_over_100 * logits


def clip_head(mean_patch, w_patch, w_img_proj, txt_feat, w_txt_proj):
    B, K = mean_patch.shape
    # TODO(synk): at realistic B, add a row-tiled "parallel" grid here so
    # v7x's second TensorCore shares the head; at B=2 launch overhead wins.
    return pl.pallas_call(
        functools.partial(_clip_head_kernel,
                          scale_over_100=LOGIT_SCALE / 100.0),
        out_shape=jax.ShapeDtypeStruct((B, B), jnp.float32),
        in_specs=[
            pl.BlockSpec((B, K), lambda: (0, 0)),
            pl.BlockSpec(w_patch.shape, lambda: (0, 0)),
            pl.BlockSpec(w_img_proj.shape, lambda: (0, 0)),
            pl.BlockSpec(txt_feat.shape, lambda: (0, 0)),
            pl.BlockSpec(w_txt_proj.shape, lambda: (0, 0)),
        ],
        out_specs=pl.BlockSpec((B, B), lambda: (0, 0)),
    )(mean_patch, w_patch, w_img_proj, txt_feat, w_txt_proj)


# -----------------------------------------------------------------------------
# CLIPLoss forward
# -----------------------------------------------------------------------------
def make_params(key, channels):
    k1, k2, k3, k4 = jax.random.split(key, 4)
    return {
        "w_patch": 0.02 * jax.random.normal(
            k1, (channels * PATCH * PATCH, WIDTH_V), jnp.float32),
        "w_img_proj": 0.02 * jax.random.normal(
            k2, (WIDTH_V, EMBED_D), jnp.float32),
        "tok_table": 0.02 * jax.random.normal(
            k3, (VOCAB, WIDTH_T), jnp.float32),
        "w_txt_proj": 0.02 * jax.random.normal(
            k4, (WIDTH_T, EMBED_D), jnp.float32),
    }


@jax.jit
def clip_loss_forward(params, image, text_tokens):
    B, C, S, _ = image.shape

    # 1) Upsample(x7) + AvgPool2d(S//32) + patchify + mean over the 7x7 patch
    #    grid, fused into one Pallas kernel (exact linear-algebra fold).
    mean_patch = upsample_avgpool_patch_mean(image)          # (B*C, 32, 32)
    mean_patch = mean_patch.reshape(B, C * PATCH * PATCH)    # (B, C*1024)

    # 2) Text encoder front-end: token-embedding lookup (XLA gather) + mean.
    # TODO(synk): text transformer + EOT-token selection replaced by mean pool.
    tok_emb = jnp.take(params["tok_table"], text_tokens, axis=0)   # (B, L, WT)
    txt_feat = tok_emb.mean(axis=1)                          # (B, WIDTH_T)

    # 3) Fused head: patch embed + projections + normalize + similarity.
    # TODO(synk): class token / positional embedding / ViT blocks replaced by
    # mean pooling over patch features (commuted in front of the matmul).
    return clip_head(mean_patch, params["w_patch"], params["w_img_proj"],
                     txt_feat, params["w_txt_proj"])


# -----------------------------------------------------------------------------
# References.
# (a) Literal pure-JAX f32 reference of the original structure
#     (upsample -> avgpool -> patchify -> patch-embed -> mean): validates the
#     linear-algebra fold end-to-end (loose tol covers bf16 MXU inputs).
# (b) Matched-precision commuted reference (same bf16 casts / matmul order as
#     the kernels): validates the Pallas plumbing tightly.
# -----------------------------------------------------------------------------
def clip_loss_reference(params, image, text_tokens):
    B, C, S, _ = image.shape
    x = image.astype(jnp.float32)
    k = S // PATCH
    up = jnp.repeat(jnp.repeat(x, UPSAMPLE, axis=2), UPSAMPLE, axis=3)
    hp = (UPSAMPLE * S) // k                                    # 224
    pooled = up.reshape(B, C, hp, k, hp, k).mean(axis=(3, 5))   # (B,C,224,224)
    g = hp // PATCH                                             # 7
    patches = pooled.reshape(B, C, g, PATCH, g, PATCH)
    patches = patches.transpose(0, 2, 4, 1, 3, 5).reshape(B, g * g, -1)
    patch_feats = patches @ params["w_patch"]                   # (B, 49, WV)
    img_emb = patch_feats.mean(axis=1) @ params["w_img_proj"]
    txt_emb = (jnp.take(params["tok_table"], text_tokens, axis=0).mean(axis=1)
               @ params["w_txt_proj"])
    img_n = img_emb / jnp.linalg.norm(img_emb, axis=-1, keepdims=True)
    txt_n = txt_emb / jnp.linalg.norm(txt_emb, axis=-1, keepdims=True)
    return 1.0 - (LOGIT_SCALE * (img_n @ txt_n.T)) / 100.0


def clip_loss_matched_reference(params, image, text_tokens):
    B, C, S, _ = image.shape
    mr = _patch_mean_matrix(S)
    mr_b = mr.astype(jnp.bfloat16)
    mrt_b = mr.T.astype(jnp.bfloat16)
    x_b = image.astype(jnp.bfloat16)
    # Same matmul order as the kernel:  t = x @ Mr^T, then Mr @ t.
    t = jnp.einsum("bckl,lq->bckq", x_b, mrt_b,
                   preferred_element_type=jnp.float32)
    mp = jnp.einsum("ik,bckq->bciq", mr_b, t.astype(jnp.bfloat16),
                    preferred_element_type=jnp.float32)          # (B,C,32,32)
    img_feat = mp.reshape(B, C * PATCH * PATCH) @ params["w_patch"]
    img_emb = img_feat @ params["w_img_proj"]
    txt_emb = (jnp.take(params["tok_table"], text_tokens, axis=0).mean(axis=1)
               @ params["w_txt_proj"])
    img_n = img_emb / jnp.linalg.norm(img_emb, axis=-1, keepdims=True)
    txt_n = txt_emb / jnp.linalg.norm(txt_emb, axis=-1, keepdims=True)
    return 1.0 - (LOGIT_SCALE * (img_n @ txt_n.T)) / 100.0


if __name__ == "__main__":
    key = jax.random.PRNGKey(0)
    k_img, k_txt, k_par = jax.random.split(key, 3)

    B, C, STYLEGAN_SIZE, SEQ = 2, 3, 64, 8       # small but shape-consistent
    # bf16 image at the producer: halves kernel A's HBM read traffic (kernel A
    # is DMA-bound on all generations); accumulation stays f32 in-kernel.
    image = jax.random.normal(
        k_img, (B, C, STYLEGAN_SIZE, STYLEGAN_SIZE),
        jnp.float32).astype(jnp.bfloat16)
    text_tokens = jax.random.randint(k_txt, (B, SEQ), 0, VOCAB, jnp.int32)
    params = make_params(k_par, C)

    sim = jax.block_until_ready(clip_loss_forward(params, image, text_tokens))

    # Tight check: same numerics (bf16 MXU inputs, same matmul order).
    ref_matched = clip_loss_matched_reference(params, image, text_tokens)
    np.testing.assert_allclose(np.asarray(sim), np.asarray(ref_matched),
                               rtol=2e-3, atol=2e-3)

    # Structural check: literal f32 upsample/avgpool/patchify/mean reference;
    # slack covers the deliberate bf16 MXU inputs of the resample.
    ref_f32 = clip_loss_reference(params, image, text_tokens)
    np.testing.assert_allclose(np.asarray(sim), np.asarray(ref_f32),
                               rtol=3e-2, atol=3e-2)

    assert sim.shape == (B, B) and sim.dtype == jnp.float32
    print("KERNEL_OK")
</pallas_src>

<mosaic_0001>
module attributes {stable_mosaic.version = 11 : i64} {
  func.func @_resample_patch_mean_kernel(%arg0: i32, %arg1: memref<3x64x64xbf16, #tpu.memory_space<vmem>>, %arg2: memref<32x64xbf16, #tpu.memory_space<vmem>>, %arg3: memref<64x32xbf16, #tpu.memory_space<vmem>>, %arg4: memref<3x32x32xf32, #tpu.memory_space<vmem>>, %arg5: memref<192x32xbf16, #tpu.memory_space<vmem>>) attributes {dimension_semantics = [#tpu.dimension_semantics<parallel>], iteration_bounds = array<i64: 2>, scalar_prefetch = 0 : i64, scratch_operands = 1 : i64, tpu.core_type = #tpu.core_type<tc>, window_params = [{transform_indices = @transform_0, window_bounds = array<i64: 3, 64, 64>}, {pipeline_mode = #tpu.pipeline_mode<synchronous>, transform_indices = @transform_1, window_bounds = array<i64: 32, 64>}, {pipeline_mode = #tpu.pipeline_mode<synchronous>, transform_indices = @transform_2, window_bounds = array<i64: 64, 32>}, {transform_indices = @transform_3, window_bounds = array<i64: 3, 32, 32>}]} {
    %c0 = arith.constant 0 : index
    %c0_0 = arith.constant 0 : index
    %c0_1 = arith.constant 0 : index
    %0 = vector.load %arg1[%c0, %c0_0, %c0_1] : memref<3x64x64xbf16, #tpu.memory_space<vmem>>, vector<3x64x64xbf16>
    %1 = vector.shape_cast %0 : vector<3x64x64xbf16> to vector<192x64xbf16>
    %c0_2 = arith.constant 0 : index
    %c0_3 = arith.constant 0 : index
    %2 = vector.load %arg3[%c0_2, %c0_3] : memref<64x32xbf16, #tpu.memory_space<vmem>>, vector<64x32xbf16>
    %cst = arith.constant dense<0.000000e+00> : vector<192x32xf32>
    %3 = tpu.matmul %1, %2, %cst {dimension_numbers = #tpu.dot_dimension_numbers<[1], [0], [0], [1], [0, 0, 1, 1], [], []>} : vector<192x64xbf16>, vector<64x32xbf16>, vector<192x32xf32> -> vector<192x32xf32>
    %4 = arith.truncf %3 : vector<192x32xf32> to vector<192x32xbf16>
    %c0_4 = arith.constant 0 : index
    %c0_5 = arith.constant 0 : index
    %5 = vector.load %arg5[%c0_4, %c0_5] : memref<192x32xbf16, #tpu.memory_space<vmem>>, vector<192x32xbf16>
    tpu.vector_store %arg5[%c0_4, %c0_5], %4 {strides = array<i32>} : memref<192x32xbf16, #tpu.memory_space<vmem>>, vector<192x32xbf16>,
    %c0_6 = arith.constant 0 : index
    %c0_7 = arith.constant 0 : index
    %6 = vector.load %arg2[%c0_6, %c0_7] : memref<32x64xbf16, #tpu.memory_space<vmem>>, vector<32x64xbf16>
    %c0_i32 = arith.constant 0 : i32
    %c64_i32 = arith.constant 64 : i32
    %7 = arith.muli %c0_i32, %c64_i32 : i32
    %8 = tpu.assume_multiple %7, 64 : i32
    %9 = arith.index_cast %8 : i32 to index
    %c0_8 = arith.constant 0 : index
    %10 = vector.load %arg5[%9, %c0_8] : memref<192x32xbf16, #tpu.memory_space<vmem>>, vector<64x32xbf16>
    %cst_9 = arith.constant dense<0.000000e+00> : vector<32x32xf32>
    %11 = tpu.matmul %6, %10, %cst_9 {dimension_numbers = #tpu.dot_dimension_numbers<[1], [0], [0], [1], [0, 0, 1, 1], [], []>} : vector<32x64xbf16>, vector<64x32xbf16>, vector<32x32xf32> -> vector<32x32xf32>
    %12 = arith.index_cast %c0_i32 : i32 to index
    %c0_10 = arith.constant 0 : index
    %c0_11 = arith.constant 0 : index
    %13 = vector.load %arg4[%12, %c0_10, %c0_11] : memref<3x32x32xf32, #tpu.memory_space<vmem>>, vector<1x32x32xf32>
    %14 = vector.shape_cast %13 : vector<1x32x32xf32> to vector<32x32xf32>
    %15 = vector.shape_cast %11 : vector<32x32xf32> to vector<1x32x32xf32>
    tpu.vector_store %arg4[%12, %c0_10, %c0_11], %15 {strides = array<i32>} : memref<3x32x32xf32, #tpu.memory_space<vmem>>, vector<1x32x32xf32>,
    %c1_i32 = arith.constant 1 : i32
    %c64_i32_12 = arith.constant 64 : i32
    %16 = arith.muli %c1_i32, %c64_i32_12 : i32
    %17 = tpu.assume_multiple %16, 64 : i32
    %18 = arith.index_cast %17 : i32 to index
    %c0_13 = arith.constant 0 : index
    %19 = vector.load %arg5[%18, %c0_13] : memref<192x32xbf16, #tpu.memory_space<vmem>>, vector<64x32xbf16>
    %cst_14 = arith.constant dense<0.000000e+00> : vector<32x32xf32>
    %20 = tpu.matmul %6, %19, %cst_14 {dimension_numbers = #tpu.dot_dimension_numbers<[1], [0], [0], [1], [0, 0, 1, 1], [], []>} : vector<32x64xbf16>, vector<64x32xbf16>, vector<32x32xf32> -> vector<32x32xf32>
    %21 = arith.index_cast %c1_i32 : i32 to index
    %c0_15 = arith.constant 0 : index
    %c0_16 = arith.constant 0 : index
    %22 = vector.load %arg4[%21, %c0_15, %c0_16] : memref<3x32x32xf32, #tpu.memory_space<vmem>>, vector<1x32x32xf32>
    %23 = vector.shape_cast %22 : vector<1x32x32xf32> to vector<32x32xf32>
    %24 = vector.shape_cast %20 : vector<32x32xf32> to vector<1x32x32xf32>
    tpu.vector_store %arg4[%21, %c0_15, %c0_16], %24 {strides = array<i32>} : memref<3x32x32xf32, #tpu.memory_space<vmem>>, vector<1x32x32xf32>,
    %c2_i32 = arith.constant 2 : i32
    %c64_i32_17 = arith.constant 64 : i32
    %25 = arith.muli %c2_i32, %c64_i32_17 : i32
    %26 = tpu.assume_multiple %25, 64 : i32
    %27 = arith.index_cast %26 : i32 to index
    %c0_18 = arith.constant 0 : index
    %28 = vector.load %arg5[%27, %c0_18] : memref<192x32xbf16, #tpu.memory_space<vmem>>, vector<64x32xbf16>
    %cst_19 = arith.constant dense<0.000000e+00> : vector<32x32xf32>
    %29 = tpu.matmul %6, %28, %cst_19 {dimension_numbers = #tpu.dot_dimension_numbers<[1], [0], [0], [1], [0, 0, 1, 1], [], []>} : vector<32x64xbf16>, vector<64x32xbf16>, vector<32x32xf32> -> vector<32x32xf32>
    %30 = arith.index_cast %c2_i32 : i32 to index
    %c0_20 = arith.constant 0 : index
    %c0_21 = arith.constant 0 : index
    %31 = vector.load %arg4[%30, %c0_20, %c0_21] : memref<3x32x32xf32, #tpu.memory_space<vmem>>, vector<1x32x32xf32>
    %32 = vector.shape_cast %31 : vector<1x32x32xf32> to vector<32x32xf32>
    %33 = vector.shape_cast %29 : vector<32x32xf32> to vector<1x32x32xf32>
    tpu.vector_store %arg4[%30, %c0_20, %c0_21], %33 {strides = array<i32>} : memref<3x32x32xf32, #tpu.memory_space<vmem>>, vector<1x32x32xf32>,
    %c3_i32 = arith.constant 3 : i32
    return
  }
  func.func @transform_0(%arg0: i32) -> (i32, i32, i32) {
    %c0_i32 = arith.constant 0 : i32
    %c0_i32_0 = arith.constant 0 : i32
    %c0_i32_1 = arith.constant 0 : i32
    return %arg0, %c0_i32, %c0_i32_0 : i32, i32, i32
  }
  func.func @transform_1(%arg0: i32) -> (i32, i32) {
    %c0_i32 = arith.constant 0 : i32
    %c0_i32_0 = arith.constant 0 : i32
    %c0_i32_1 = arith.constant 0 : i32
    return %c0_i32, %c0_i32_0 : i32, i32
  }
  func.func @transform_2(%arg0: i32) -> (i32, i32) {
    %c0_i32 = arith.constant 0 : i32
    %c0_i32_0 = arith.constant 0 : i32
    %c0_i32_1 = arith.constant 0 : i32
    return %c0_i32, %c0_i32_0 : i32, i32
  }
  func.func @transform_3(%arg0: i32) -> (i32, i32, i32) {
    %c0_i32 = arith.constant 0 : i32
    %c0_i32_0 = arith.constant 0 : i32
    %c0_i32_1 = arith.constant 0 : i32
    return %arg0, %c0_i32, %c0_i32_0 : i32, i32, i32
  }
}

module attributes {stable_mosaic.version = 11 : i64} {
  func.func @_clip_head_kernel(%arg0: memref<2x3072xf32, #tpu.memory_space<vmem>>, %arg1: memref<3072x128xf32, #tpu.memory_space<vmem>>, %arg2: memref<128x128xf32, #tpu.memory_space<vmem>>, %arg3: memref<2x64xf32, #tpu.memory_space<vmem>>, %arg4: memref<64x128xf32, #tpu.memory_space<vmem>>, %arg5: memref<2x2xf32, #tpu.memory_space<vmem>>) attributes {dimension_semantics = [], scalar_prefetch = 0 : i64, scratch_operands = 0 : i64, tpu.core_type = #tpu.core_type<tc>} {
    %c0 = arith.constant 0 : index
    %c0_0 = arith.constant 0 : index
    %0 = vector.load %arg0[%c0, %c0_0] : memref<2x3072xf32, #tpu.memory_space<vmem>>, vector<2x3072xf32>
    %c0_1 = arith.constant 0 : index
    %c0_2 = arith.constant 0 : index
    %1 = vector.load %arg1[%c0_1, %c0_2] : memref<3072x128xf32, #tpu.memory_space<vmem>>, vector<3072x128xf32>
    %cst = arith.constant dense<0.000000e+00> : vector<2x128xf32>
    %2 = tpu.matmul %0, %1, %cst {dimension_numbers = #tpu.dot_dimension_numbers<[1], [0], [0], [1], [0, 0, 1, 1], [], []>} : vector<2x3072xf32>, vector<3072x128xf32>, vector<2x128xf32> -> vector<2x128xf32>
    %c0_3 = arith.constant 0 : index
    %c0_4 = arith.constant 0 : index
    %3 = vector.load %arg2[%c0_3, %c0_4] : memref<128x128xf32, #tpu.memory_space<vmem>>, vector<128x128xf32>
    %cst_5 = arith.constant dense<0.000000e+00> : vector<2x128xf32>
    %4 = tpu.matmul %2, %3, %cst_5 {dimension_numbers = #tpu.dot_dimension_numbers<[1], [0], [0], [1], [0, 0, 1, 1], [], []>} : vector<2x128xf32>, vector<128x128xf32>, vector<2x128xf32> -> vector<2x128xf32>
    %c0_6 = arith.constant 0 : index
    %c0_7 = arith.constant 0 : index
    %5 = vector.load %arg3[%c0_6, %c0_7] : memref<2x64xf32, #tpu.memory_space<vmem>>, vector<2x64xf32>
    %c0_8 = arith.constant 0 : index
    %c0_9 = arith.constant 0 : index
    %6 = vector.load %arg4[%c0_8, %c0_9] : memref<64x128xf32, #tpu.memory_space<vmem>>, vector<64x128xf32>
    %cst_10 = arith.constant dense<0.000000e+00> : vector<2x128xf32>
    %7 = tpu.matmul %5, %6, %cst_10 {dimension_numbers = #tpu.dot_dimension_numbers<[1], [0], [0], [1], [0, 0, 1, 1], [], []>} : vector<2x64xf32>, vector<64x128xf32>, vector<2x128xf32> -> vector<2x128xf32>
    %8 = arith.mulf %4, %4 : vector<2x128xf32>
    %cst_11 = arith.constant dense<0.000000e+00> : vector<2xf32>
    %9 = vector.multi_reduction <add>, %8, %cst_11 [1] : vector<2x128xf32> to vector<2xf32>
    %10 = vector.shape_cast %9 : vector<2xf32> to vector<2x1xf32>
    %11 = math.rsqrt %10 : vector<2x1xf32>
    %12 = vector.broadcast %11 : vector<2x1xf32> to vector<2x128xf32>
    %13 = arith.mulf %4, %12 : vector<2x128xf32>
    %14 = arith.mulf %7, %7 : vector<2x128xf32>
    %cst_12 = arith.constant dense<0.000000e+00> : vector<2xf32>
    %15 = vector.multi_reduction <add>, %14, %cst_12 [1] : vector<2x128xf32> to vector<2xf32>
    %16 = vector.shape_cast %15 : vector<2xf32> to vector<2x1xf32>
    %17 = math.rsqrt %16 : vector<2x1xf32>
    %18 = vector.broadcast %17 : vector<2x1xf32> to vector<2x128xf32>
    %19 = arith.mulf %7, %18 : vector<2x128xf32>
    %cst_13 = arith.constant dense<0.000000e+00> : vector<2x2xf32>
    %20 = tpu.matmul %13, %19, %cst_13 {dimension_numbers = #tpu.dot_dimension_numbers<[1], [1], [0], [0], [0, 0, 1, 0], [], []>} : vector<2x128xf32>, vector<2x128xf32>, vector<2x2xf32> -> vector<2x2xf32>
    %cst_14 = arith.constant 1.000000e+00 : f32
    %21 = vector.broadcast %cst_14 : f32 to vector<2x2xf32>
    %22 = arith.mulf %21, %20 : vector<2x2xf32>
    %cst_15 = arith.constant 1.000000e+00 : f32
    %23 = vector.broadcast %cst_15 : f32 to vector<2x2xf32>
    %24 = arith.subf %23, %22 : vector<2x2xf32>
    %c0_16 = arith.constant 0 : index
    %c0_17 = arith.constant 0 : index
    %25 = vector.load %arg5[%c0_16, %c0_17] : memref<2x2xf32, #tpu.memory_space<vmem>>, vector<2x2xf32>
    tpu.vector_store %arg5[%c0_16, %c0_17], %24 {strides = array<i32>} : memref<2x2xf32, #tpu.memory_space<vmem>>, vector<2x2xf32>,
    return
  }
}

</mosaic_0001>

<bundles_post_ra>
// kernel: clip_loss_forward.2
= control target key start
LH: loop header
LB: loop body
LE: loop exit
PB: predicated region body
PF: predicated region fallthrough
CT: control target
= control target key end

     0   :  { %8 = vsyncpa [#allocation4], 0  ;;  %s1388_s0 = inlined_call_operand.hbm [shape: bf16[6,64,64], index: 0, kind: input, shape index: {}]   ;;  %s1389_s1 = inlined_call_operand.hbm [shape: bf16[32,64], index: 1, kind: input, shape index: {}]   ;;  %s1390_s2 = inlined_call_operand.hbm [shape: bf16[64,32], index: 2, kind: input, shape index: {}]   ;;  %s1391_s3 = inlined_call_operand.vmem [shape: f32[6,32,32], index: 3, kind: output, shape index: {}]  }
   0x1   :  { %10 = vsyncpa [#allocation4 + $0x1], 0 }
   0x2   :  { %11 = vsyncpa [#allocation6], 0  ;;  %s1202_s12 = smov 0   ;;  %s1204_s13 = smov 0  }
   0x3   :  { %s1206_s14 = smov 0   ;;  %s1208_s15 = smov 0  }
   0x4 LB: > { %s781_s16 = sadd.s32 4294967295, %s1176_s15   ;;  %p37_p0 = scmp.ne.s32.totalorder %s1168_s13, %s1164_s12  ;;  %s1176_s15 = sphi %s1208_s15, %s1399_s15   ;;  %s1172_s14 = sphi %s1206_s14, %s1398_s14   ;;  %s1168_s13 = sphi %s1204_s13, %s1397_s13   ;;  %s1164_s12 = sphi %s1202_s12, %s1396_s12  }
   0x5   : > { %p1224_p1 = scmp.eq.s32.totalorder %s781_s16, 0  ;;  %p783_p2 = scmp.ge.s32.totalorder %s1176_s15, 1 }
   0x6   : > { %p116_p3 = scmp.lt.s32.totalorder %s1176_s15, 3  ;;  %s127_s21 = sshll.u32 %s1389_s1, 4  ;;  %s128_s21 = int_to_ptr.hbm [resolvable:$true] %s127_s21 }
   0x7   : > { %p1232_p4 = por %p1224_p1, %p37_p0  ;;  %s1178_s23 = smov [#allocation5]  }
   0x8   : > { %p1239_p5 = pnand %p783_p2, %p116_p3  ;;  %s129_s24 = sshll.u32 %s1178_s23, 4  ;;  %s130_s24 = int_to_ptr.vmem [resolvable:$true] %s129_s24 }
   0x9   : > { %s141_s27 = sshll.u32 %s1390_s2, 4  ;;  %s1179_s28 = smov 64   ;;  %s142_s27 = int_to_ptr.hbm [resolvable:$true] %s141_s27 }
   0xa   : > { %p996_p6 = pneg %p1239_p5  ;;  %s1180_s29 = smov 4  }
   0xb   : > { %s1181_s30 = smov [#allocation7]   ;;  %s1257_s5 = sadd.s32 1, %s1176_s15  }
   0xc   : > { %p997_p7 = pnand %p996_p6, %p1224_p1  ;;  %s143_s4 = sshll.u32 %s1181_s30, 4  ;;  %s144_s4 = int_to_ptr.vmem [resolvable:$true] %s143_s4 }
   0xd   : > { %s24_s6 = sadd.s32 1, %s1172_s14  ;;  %s21_s7 = ssub.s32 %s1176_s15, %s1257_s5 }
   0xe   : > { %999 = dma.hbm_to_vmem [thread:$0]  (!%p997_p7), %s128_s21, 256, %s130_s24, [#allocation6], %s1179_s28, %s1179_s28, %s1180_s29  }
   0xf   : > { %1002 = dma.hbm_to_vmem [thread:$0]  (!%p997_p7), %s142_s27, 512, %s144_s4, [#allocation6], %s1179_s28, %s1179_s28, %s1180_s29  }
  0x10   : > { %p31_p8 = scmp.ne.s32.totalorder %s1172_s14, %s1168_s13  ;;  %p22_p9 = scmp.eq.s32.totalorder %s21_s7, 0 }
  0x11   : > { %p32_p10 = scmp.eq.s32.totalorder %s1176_s15, 0  ;;  %p1009_p11 = scmp.lt.s32.totalorder %s1176_s15, 2 }
  0x12   : > { %s157_s8 = sand.u32 1, %s1172_s14   ;;  %s975_s11 = smul.u32 96, %s1176_s15 }
  0x13   : > { %s1268_s9 = scalar_select %p22_p9, %s1172_s14, %s24_s6  }
  0x14   : > { %p33_p12 = por %p32_p10, %p31_p8  ;;  %s984_s10 = smul.u32 96, %s157_s8 }
  0x15   : > { %s167_s21 = scalar_lea.hbm %s1388_s0, %s975_s11  ;;  %s158_s26 = scalar_lea.sflag [#allocation4], %s157_s8 }
  0x16   : > { %p1271_p13 = pnand %p1009_p11, %p33_p12  ;;  %s161_s23 = scalar_lea.vmem [#allocation3], %s984_s10 }
  0x17   : > { %s170_s24 = sshll.u32 %s161_s23, 4  ;;  %s168_s25 = sshll.u32 %s167_s21, 4  ;;  %s171_s24 = int_to_ptr.vmem [resolvable:$true] %s170_s24  ;;  %s169_s25 = int_to_ptr.hbm [resolvable:$true] %s168_s25 }
  0x18   : > { %s1108_s27 = sshra.s32 %s169_s25, 4  ;;  %p1112_p2 = pneg %p1271_p13  ;;  %s1109_s27 = int_to_ptr.hbm [resolvable:$true] %s1108_s27 }
  0x19   : > { %s1110_s30 = scalar_lea.hbm %s1109_s27, 96  ;;  %s1115_s7 = scalar_lea.hbm %s1388_s0, 192 }
  0x1a   : > { %p1111_p0 = scmp.ne.s32.totalorder %s1109_s27, %s1110_s30  ;;  %p1116_p7 = scmp.lt.s32.totalorder %s1109_s27, %s1388_s0 }
  0x1b   : > { %p1117_p8 = scmp.lt.s32.totalorder %s1115_s7, %s1110_s30 }
  0x1c   : > { %p1113_p3 = pnand %p1112_p2, %p1111_p0 }
  0x1d   : > { %p1118_p9 = por %p1117_p8, %p1116_p7 }
  0x1e   : > { %p1114_p6 = pneg %p1113_p3 }
  0x20   : > { %p1119_p10 = pnand %p1118_p9, %p1114_p6 }
  0x22   : > { %1122 = shalt.err (!%p1119_p10)
}
  0x23   : > { %1006 = dma.hbm_to_vmem [thread:$0]  (!%p1271_p13), %s169_s25, 1536, %s171_s24, %s158_s26, %s1179_s28, %s1179_s28, %s1180_s29  }
  0x24   : > { %182 = sbr.rel (%p1239_p5) target bundleno = 460 (0x1cc), region = 32  ;;  %s184_s8 = sand.u32 (!%p1239_p5), 1, %s1168_s13  }
  0x25   : > { %s985_s10 = smul.u32 (!%p1239_p5), 96, %s184_s8  ;;  %s185_s20 = scalar_lea.sflag (!%p1239_p5), [#allocation4], %s184_s8 }
  0x27   : > { %s1294_s21 = scalar_lea.vmem (!%p1239_p5), [#allocation3], %s985_s10 }
  0x29   : > { %1155 = dma.done.wait (%p1232_p4), %s185_s20, 1536  }
  0x2a   : > { %1157 = vsyncadd (%p1232_p4), %s185_s20, 4294965760 }
  0x2b   : > { %1159 = dma.done.wait (%p1224_p1), [#allocation6], 768  }
  0x2c   : > { %1161 = vsyncadd (%p1224_p1), [#allocation6], 4294966528  ;;  %v960_v0 = vld [vmem:[#allocation7 + $0x18] sm:$0xff]  ;;  %v959_v1 = vld [vmem:[#allocation7 + $0x10] sm:$0xff]  ;;  %vm348_vm0 = vcmask 523264   ;;  %vm478_vm1 = vcmask 257024  }
  0x2d   : > { %389 = vmatpush.bf16.msra.mxu0 %v960_v0  ;;  %976 = vmatpush.bf16.msra.mxu1 %v960_v0  ;;  %v958_v2 = vld [vmem:[#allocation7 + $0x8] sm:$0xff]  ;;  %v957_v3 = vld [vmem:[#allocation7] sm:$0xff]  ;;  %v945_v4 = vld [vmem:[%s1294_s21] sm:$0xff]  ;;  %s224_s17 = smul.u32 3, %s781_s16  ;;  %vm574_vm2 = vcmask 261120  }
  0x2e   : > { %977 = vmatpush.bf16.msra.mxu2 %v960_v0  ;;  %v950_v5 = vld [vmem:[%s1294_s21 + $0x28] sm:$0xff]  ;;  %v953_v6 = vld [vmem:[%s1294_s21 + $0x40] sm:$0xff]  ;;  %v951_v8 = vld [vmem:[%s1294_s21 + $0x30] sm:$0xff] }
  0x2f   : > { %v946_v7 = vld [vmem:[%s1294_s21 + $0x8] sm:$0xff]  ;;  %v947_v10 = vld [vmem:[%s1294_s21 + $0x10] sm:$0xff]  ;;  %v952_v11 = vld [vmem:[%s1294_s21 + $0x38] sm:$0xff]  ;;  %p225_p1 = scmp.lt.s32.totalorder %s224_s17, 5 }
  0x30   : > { %v954_v9 = vld [vmem:[%s1294_s21 + $0x48] sm:$0xff]  ;;  %v955_v12 = vld [vmem:[%s1294_s21 + $0x50] sm:$0xff]  ;;  %v948_v13 = vld [vmem:[%s1294_s21 + $0x18] sm:$0xff] }
  0x31   : > { %390 = vmatpush.bf16.msra.mxu0 %v959_v1  ;;  %978 = vmatpush.bf16.msra.mxu1 %v959_v1  ;;  %v956_v14 = vld [vmem:[%s1294_s21 + $0x58] sm:$0xff]  ;;  %v949_v15 = vld [vmem:[%s1294_s21 + $0x20] sm:$0xff]  ;;  %s1401_s17 = smov (!%p225_p1, %s224_s17), 5 }
  0x32   : > { %979 = vmatpush.bf16.msra.mxu2 %v959_v1  ;;  %s944_s18 = sshll.u32 %s1401_s17, 5 }
  0x33   : > { %s229_s29 = scalar_lea.vmem %s1391_s3, %s944_s18 }
  0x35   : > { %391 = vmatpush.bf16.msra.mxu0 %v958_v2  ;;  %980 = vmatpush.bf16.msra.mxu1 %v958_v2 }
  0x36   : > { %981 = vmatpush.bf16.msra.mxu2 %v958_v2 }
  0x39   : > { %392 = vmatpush.bf16.msra.mxu0 %v957_v3  ;;  %982 = vmatpush.bf16.msra.mxu1 %v957_v3 }
  0x3a   : > { %983 = vmatpush.bf16.msra.mxu2 %v957_v3 }
  0x3c   : > { %858 = vmatmul.msk.bf16.vlgmr.msra.gmra.mxu0 %vm348_vm0, %v945_v4  ;;  %863 = vmatmul.msk.bf16.vlgmr.msra.gmra.mxu1 %vm348_vm0, %v950_v5 }
  0x3d   : > { %866 = vmatmul.msk.bf16.vlgmr.msra.gmra.mxu2 %vm348_vm0, %v953_v6 }
  0x4c   : > { %859 = vmatmul.msk.bf16.gmra.mxu0 %vm348_vm0, %v946_v7  ;;  %864 = vmatmul.msk.bf16.gmra.mxu1 %vm348_vm0, %v951_v8  ;;  %v961_v8 = vld [vmem:[#allocation5] sm:$0xff] }
  0x4d   : > { %867 = vmatmul.msk.bf16.gmra.mxu2 %vm348_vm0, %v954_v9 }
  0x5c   : > { %860 = vmatmul.msk.bf16.gmra.mxu0 %vm348_vm0, %v947_v10  ;;  %865 = vmatmul.msk.bf16.gmra.mxu1 %vm348_vm0, %v952_v11 }
  0x5d   : > { %868 = vmatmul.msk.bf16.gmra.mxu2 %vm348_vm0, %v955_v12 }
  0x6c   : > { %861 = vmatmul.msk.bf16.gmra.mxu0 %vm348_vm0, %v948_v13  ;;  %v962_v13 = vld [vmem:[#allocation5 + $0x8] sm:$0xff] }
  0x6d   : > { %869 = vmatmul.msk.bf16.gmra.mxu2 %vm348_vm0, %v956_v14 }
  0x7c   : > { %862 = vmatmul.msk.bf16.gmra.mxu0 %vm348_vm0, %v949_v15 }
  0xb9   : > { %v394_v16 = vpop.f32.mrf.mxu0  ;;  %v419_v17 = vpop.f32.mrf.mxu1 }
  0xba   : > { %v454_v18 = vpack.c.bf16 %v394_v16, %v394_v16  ;;  %v464_v19 = vpack.c.bf16 %v419_v17, %v419_v17 }
  0xbc   : > { %479 = vst.msk [vmem:[#allocation2] sm:$0xf] %vm478_vm1, %v454_v18 }
  0xbd   : > { %489 = vst.msk [vmem:[#allocation2 + $0x28] sm:$0xf] %vm478_vm1, %v464_v19 }
  0xc0   : > { %v434_v20 = vpop.f32.mrf.mxu2 }
  0xc1   : > { %v396_v21 = vpop.f32.mrf.mxu0  ;;  %v421_v22 = vpop.f32.mrf.mxu1  ;;  %v470_v23 = vpack.c.bf16 %v434_v20, %v434_v20 }
  0xc2   : > { %v455_v24 = vpack.c.bf16 %v396_v21, %v396_v21  ;;  %v465_v25 = vpack.c.bf16 %v421_v22, %v421_v22 }
  0xc3   : > { %495 = vst.msk [vmem:[#allocation2 + $0x40] sm:$0xf] %vm478_vm1, %v470_v23 }
  0xc4   : > { %480 = vst.msk [vmem:[#allocation2 + $0x4] sm:$0xf] %vm478_vm1, %v455_v24 }
  0xc5   : > { %490 = vst.msk [vmem:[#allocation2 + $0x2c] sm:$0xf] %vm478_vm1, %v465_v25 }
  0xc8   : > { %v436_v26 = vpop.f32.mrf.mxu2 }
  0xc9   : > { %v399_v27 = vpop.f32.mrf.mxu0  ;;  %v424_v28 = vpop.f32.mrf.mxu1  ;;  %v471_v29 = vpack.c.bf16 %v436_v26, %v436_v26 }
  0xca   : > { %v456_v30 = vpack.c.bf16 %v399_v27, %v399_v27  ;;  %v466_v31 = vpack.c.bf16 %v424_v28, %v424_v28 }
  0xcb   : > { %496 = vst.msk [vmem:[#allocation2 + $0x44] sm:$0xf] %vm478_vm1, %v471_v29  ;;  %v963_v6 = vld [vmem:[#allocation2] sm:$0xff] }
  0xcc   : > { %481 = vst.msk [vmem:[#allocation2 + $0x8] sm:$0xf] %vm478_vm1, %v456_v30  ;;  %v968_v60 = vld [vmem:[#allocation2 + $0x28] sm:$0xff] }
  0xcd   : > { %491 = vst.msk [vmem:[#allocation2 + $0x30] sm:$0xf] %vm478_vm1, %v466_v31 }
  0xd0   : > { %v439_v32 = vpop.f32.mrf.mxu2 }
  0xd1   : > { %v401_v33 = vpop.f32.mrf.mxu0  ;;  %v426_v34 = vpop.f32.mrf.mxu1  ;;  %v472_v35 = vpack.c.bf16 %v439_v32, %v439_v32 }
  0xd2   : > { %v457_v36 = vpack.c.bf16 %v401_v33, %v401_v33  ;;  %v467_v37 = vpack.c.bf16 %v426_v34, %v426_v34  ;;  %v971_v12 = vld [vmem:[#allocation2 + $0x40] sm:$0xff] }
  0xd3   : > { %497 = vst.msk [vmem:[#allocation2 + $0x48] sm:$0xf] %vm478_vm1, %v472_v35 }
  0xd4   : > { %482 = vst.msk [vmem:[#allocation2 + $0xc] sm:$0xf] %vm478_vm1, %v457_v36 }
  0xd5   : > { %492 = vst.msk [vmem:[#allocation2 + $0x34] sm:$0xf] %vm478_vm1, %v467_v37 }
  0xd8   : > { %v441_v38 = vpop.f32.mrf.mxu2 }
  0xd9   : > { %v404_v39 = vpop.f32.mrf.mxu0  ;;  %v429_v40 = vpop.f32.mrf.mxu1  ;;  %v473_v41 = vpack.c.bf16 %v441_v38, %v441_v38 }
  0xda   : > { %v458_v42 = vpack.c.bf16 %v404_v39, %v404_v39  ;;  %v468_v43 = vpack.c.bf16 %v429_v40, %v429_v40 }
  0xdb   : > { %498 = vst.msk [vmem:[#allocation2 + $0x4c] sm:$0xf] %vm478_vm1, %v473_v41  ;;  %v964_v5 = vld [vmem:[#allocation2 + $0x8] sm:$0xff] }
  0xdc   : > { %483 = vst.msk [vmem:[#allocation2 + $0x10] sm:$0xf] %vm478_vm1, %v458_v42  ;;  %v969_v55 = vld [vmem:[#allocation2 + $0x30] sm:$0xff] }
  0xdd   : > { %493 = vst.msk [vmem:[#allocation2 + $0x38] sm:$0xf] %vm478_vm1, %v468_v43 }
  0xe0   : > { %v444_v44 = vpop.f32.mrf.mxu2 }
  0xe1   : > { %v406_v45 = vpop.f32.mrf.mxu0  ;;  %v431_v46 = vpop.f32.mrf.mxu1  ;;  %v474_v47 = vpack.c.bf16 %v444_v44, %v444_v44 }
  0xe2   : > { %v459_v48 = vpack.c.bf16 %v406_v45, %v406_v45  ;;  %v469_v49 = vpack.c.bf16 %v431_v46, %v431_v46  ;;  %v972_v11 = vld [vmem:[#allocation2 + $0x48] sm:$0xff] }
  0xe3   : > { %499 = vst.msk [vmem:[#allocation2 + $0x50] sm:$0xf] %vm478_vm1, %v474_v47 }
  0xe4   : > { %484 = vst.msk [vmem:[#allocation2 + $0x14] sm:$0xf] %vm478_vm1, %v459_v48 }
  0xe5   : > { %494 = vst.msk [vmem:[#allocation2 + $0x3c] sm:$0xf] %vm478_vm1, %v469_v49 }
  0xe8   : > { %v446_v50 = vpop.f32.mrf.mxu2 }
  0xe9   : > { %v409_v51 = vpop.f32.mrf.mxu0  ;;  %v475_v52 = vpack.c.bf16 %v446_v50, %v446_v50 }
  0xea   : > { %v460_v53 = vpack.c.bf16 %v409_v51, %v409_v51 }
  0xeb   : > { %500 = vst.msk [vmem:[#allocation2 + $0x54] sm:$0xf] %vm478_vm1, %v475_v52  ;;  %v965_v2 = vld [vmem:[#allocation2 + $0x10] sm:$0xff] }
  0xec   : > { %485 = vst.msk [vmem:[#allocation2 + $0x18] sm:$0xf] %vm478_vm1, %v460_v53  ;;  %v970_v54 = vld [vmem:[#allocation2 + $0x38] sm:$0xff] }
  0xed   : > { %616 = vmatpush.bf16.msra.mxu3 %v970_v54 }
  0xf0   : > { %v449_v56 = vpop.f32.mrf.mxu2 }
  0xf1   : > { %v411_v57 = vpop.f32.mrf.mxu0  ;;  %v476_v58 = vpack.c.bf16 %v449_v56, %v449_v56  ;;  %617 = vmatpush.bf16.msra.mxu3 %v969_v55 }
  0xf2   : > { %v461_v59 = vpack.c.bf16 %v411_v57, %v411_v57  ;;  %v973_v10 = vld [vmem:[#allocation2 + $0x50] sm:$0xff] }
  0xf3   : > { %501 = vst.msk [vmem:[#allocation2 + $0x58] sm:$0xf] %vm478_vm1, %v476_v58 }
  0xf4   : > { %486 = vst.msk [vmem:[#allocation2 + $0x1c] sm:$0xf] %vm478_vm1, %v461_v59 }
  0xf5   : > { %618 = vmatpush.bf16.msra.mxu3 %v968_v60 }
  0xf8   : > { %v451_v61 = vpop.f32.mrf.mxu2 }
  0xf9   : > { %v414_v62 = vpop.f32.mrf.mxu0  ;;  %v477_v63 = vpack.c.bf16 %v451_v61, %v451_v61 }
  0xfa   : > { %v462_v0 = vpack.c.bf16 %v414_v62, %v414_v62 }
  0xfb   : > { %502 = vst.msk [vmem:[#allocation2 + $0x5c] sm:$0xf] %vm478_vm1, %v477_v63  ;;  %v966_v1 = vld [vmem:[#allocation2 + $0x18] sm:$0xff] }
  0xfc   : > { %487 = vst.msk [vmem:[#allocation2 + $0x20] sm:$0xf] %vm478_vm1, %v462_v0  ;;  %559 = vmatpush.bf16.msrb.mxu1 %v966_v1 }
 0x100   : > { %560 = vmatpush.bf16.msrb.mxu1 %v965_v2 }
 0x101   : > { %v416_v3 = vpop.f32.mrf.mxu0 }
 0x102   : > { %v463_v4 = vpack.c.bf16 %v416_v3, %v416_v3  ;;  %v974_v7 = vld [vmem:[#allocation2 + $0x58] sm:$0xff] }
 0x104   : > { %488 = vst.msk [vmem:[#allocation2 + $0x24] sm:$0xf] %vm478_vm1, %v463_v4  ;;  %561 = vmatpush.bf16.msrb.mxu1 %v964_v5 }
 0x108   : > { %562 = vmatpush.bf16.msrb.mxu1 %v963_v6 }
 0x10b   : > { %v967_v9 = vld [vmem:[#allocation2 + $0x20] sm:$0xff]  ;;  %894 = vmatmul.msk.bf16.vlgmr.msrb.gmra.mxu1 %vm348_vm0, %v961_v8 }
 0x10c   : > { %619 = vmatpush.bf16.msra.mxu3 %v967_v9 }
 0x10f   : > { %912 = vmatmul.msk.bf16.vlgmr.msra.gmra.mxu3 %vm348_vm0, %v961_v8 }
 0x110   : > { %673 = vmatpush.bf16.msrb.mxu3 %v974_v7 }
 0x114   : > { %674 = vmatpush.bf16.msrb.mxu3 %v973_v10 }
 0x118   : > { %675 = vmatpush.bf16.msrb.mxu3 %v972_v11 }
 0x11b   : > { %895 = vmatmul.msk.bf16.gmra.mxu1 %vm348_vm0, %v962_v13 }
 0x11c   : > { %676 = vmatpush.bf16.msrb.mxu3 %v971_v12 }
 0x11f   : > { %913 = vmatmul.msk.bf16.gmra.mxu3 %vm348_vm0, %v962_v13 }
 0x12f   : > { %934 = vmatmul.msk.bf16.vlgmr.msrb.gmra.mxu3 %vm348_vm0, %v961_v8 }
 0x13f   : > { %935 = vmatmul.msk.bf16.gmra.mxu3 %vm348_vm0, %v962_v13 }
 0x188   : > { %v564_v14 = vpop.f32.mrf.mxu1 }
 0x189   : > { %575 = vst.msk [vmem:[%s229_s29] sm:$0xff] %vm574_vm2, %v564_v14 }
 0x190   : > { %v566_v15 = vpop.f32.mrf.mxu1 }
 0x191   : > { %576 = vst.msk [vmem:[%s229_s29 + $0x8] sm:$0xff] %vm574_vm2, %v566_v15 }
 0x192   : > { %v621_v16 = vpop.f32.mrf.mxu3 }
 0x193   : > { %914 = vst.msk [vmem:[%s229_s29 + $0x20] sm:$0xff] %vm574_vm2, %v621_v16 }
 0x198   : > { %v569_v17 = vpop.f32.mrf.mxu1 }
 0x199   : > { %577 = vst.msk [vmem:[%s229_s29 + $0x10] sm:$0xff] %vm574_vm2, %v569_v17 }
 0x19a   : > { %v623_v18 = vpop.f32.mrf.mxu3 }
 0x19b   : > { %915 = vst.msk [vmem:[%s229_s29 + $0x28] sm:$0xff] %vm574_vm2, %v623_v18 }
 0x1a0   : > { %v571_v19 = vpop.f32.mrf.mxu1 }
 0x1a1   : > { %578 = vst.msk [vmem:[%s229_s29 + $0x18] sm:$0xff] %vm574_vm2, %v571_v19 }
 0x1a2   : > { %v626_v20 = vpop.f32.mrf.mxu3 }
 0x1a3   : > { %916 = vst.msk [vmem:[%s229_s29 + $0x30] sm:$0xff] %vm574_vm2, %v626_v20 }
 0x1aa   : > { %v628_v21 = vpop.f32.mrf.mxu3 }
 0x1ab   : > { %917 = vst.msk [vmem:[%s229_s29 + $0x38] sm:$0xff] %vm574_vm2, %v628_v21 }
 0x1b2   : > { %v678_v22 = vpop.f32.mrf.mxu3 }
 0x1b3   : > { %936 = vst.msk [vmem:[%s229_s29 + $0x40] sm:$0xff] %vm574_vm2, %v678_v22 }
 0x1ba   : > { %v680_v23 = vpop.f32.mrf.mxu3 }
 0x1bb   : > { %937 = vst.msk [vmem:[%s229_s29 + $0x48] sm:$0xff] %vm574_vm2, %v680_v23 }
 0x1c2   : > { %v683_v24 = vpop.f32.mrf.mxu3 }
 0x1c3   : > { %938 = vst.msk [vmem:[%s229_s29 + $0x50] sm:$0xff] %vm574_vm2, %v683_v24 }
 0x1ca   : > { %v685_v25 = vpop.f32.mrf.mxu3 }
 0x1cb   : > { %939 = vst.msk [vmem:[%s229_s29 + $0x58] sm:$0xff] %vm574_vm2, %v685_v25 }
 0x1cc PF: > { %p14_p4 = scmp.ge.s32.totalorder %s1257_s5, 4   ;;  %s1396_s12 = smov %s1168_s13 }
 0x1cd   : > { %s1397_s13 = smov %s1172_s14  ;;  %s1398_s14 = smov %s1268_s9 }
 0x1ce   : > { %s1399_s15 = smov %s1257_s5  ;;  %16 = sbr.rel (!%p14_p4) target bundleno = 4 (0x4), region = 84 }
 0x1d3   :  { %717 = vsyncpa [#allocation4], 1 }
 0x1d4   :  { %719 = vsyncpa [#allocation4 + $0x1], 1 }
 0x1d5   :  { %720 = vsyncpa [#allocation6], 1 }

// kernel: clip_loss_forward.3
= control target key start
LH: loop header
LB: loop body
LE: loop exit
PB: predicated region body
PF: predicated region fallthrough
CT: control target
= control target key end

     0   :  { %10 = vsyncpa [#allocation3], 0  ;;  %s1367_s0 = inlined_call_operand.vmem [shape: f32[2,3072], index: 0, kind: input, shape index: {}]   ;;  %s1368_s1 = inlined_call_operand.hbm [shape: f32[3072,128], index: 1, kind: input, shape index: {}]   ;;  %s1369_s2 = inlined_call_operand.hbm [shape: f32[128,128], index: 2, kind: input, shape index: {}]   ;;  %s1370_s3 = inlined_call_operand.vmem [shape: f32[2,64], index: 3, kind: input, shape index: {}]   ;;  %s1371_s4 = inlined_call_operand.hbm [shape: f32[64,128], index: 4, kind: input, shape index: {}]   ;;  %s1372_s5 = inlined_call_operand.hbm [shape: f32[2,2], index: 5, kind: output, shape index: {}]  }
   0x1   :  { %11 = vsyncpa [#allocation6], 0 }
   0x2   :  { %12 = vsyncpa [#allocation4], 0  ;;  %s32_s20 = sshll.u32 %s1369_s2, 4  ;;  %s1253_s21 = smov [#allocation5]   ;;  %s33_s20 = int_to_ptr.hbm [resolvable:$true] %s32_s20 }
   0x3   :  { %s34_s22 = sshll.u32 %s1253_s21, 4  ;;  %s19_s25 = sshll.u32 %s1368_s1, 4  ;;  %s35_s22 = int_to_ptr.vmem [resolvable:$true] %s34_s22  ;;  %s20_s25 = int_to_ptr.hbm [resolvable:$true] %s19_s25 }
   0x4   :  { %s1254_s26 = smov 128   ;;  %s1255_s27 = smov 8  }
   0x5   :  { %40 = dma.hbm_to_vmem [thread:$0]  %s33_s20, 2048, %s35_s22, [#allocation6], %s1254_s26, %s1254_s26, %s1255_s27  }
   0x6   :  { %s1256_s28 = smov [#allocation2]   ;;  %s47_s7 = sshll.u32 %s1371_s4, 4  ;;  %s48_s7 = int_to_ptr.hbm [resolvable:$true] %s47_s7 }
   0x7   :  { %s21_s29 = sshll.u32 %s1256_s28, 4  ;;  %s1257_s2 = smov [#allocation7]   ;;  %s22_s29 = int_to_ptr.vmem [resolvable:$true] %s21_s29 }
   0x8   :  { %27 = dma.hbm_to_vmem [thread:$0]  %s20_s25, 49152, %s22_s29, [#allocation3], %s1254_s26, %s1254_s26, %s1255_s27  }
   0x9   :  { %s49_s8 = sshll.u32 %s1257_s2, 4  ;;  %s50_s8 = int_to_ptr.vmem [resolvable:$true] %s49_s8 }
   0xa   :  { %55 = dma.hbm_to_vmem [thread:$0]  %s48_s7, 1024, %s50_s8, [#allocation6], %s1254_s26, %s1254_s26, %s1255_s27  }
   0xb   :  { %1247 = dma.done.wait [#allocation3], 49152  }
   0xc   :  { %1248 = vsyncadd [#allocation3], 4294918144 }
   0xd   :  { %1249 = dma.done.wait [#allocation6], 3072  }
   0xe   :  { %1250 = vsyncadd [#allocation6], 4294964224  ;;  %v89_v0 = vld [vmem:[#allocation2 + $0x78] sm:$0xff]  ;;  %v88_v3 = vld [vmem:[#allocation2 + $0x70] sm:$0xff]  ;;  %vm1044_vm0 = vcmask 523264   ;;  %vm1069_vm1 = vcmask 1041408  }
   0xf   :  { %v105_v1 = vld [vmem:[#allocation2 + $0xf8] sm:$0xff]  ;;  %519 = vmatpush.msra.mxu0 %v89_v0  ;;  %v104_v4 = vld [vmem:[#allocation2 + $0xf0] sm:$0xff]  ;;  %v87_v7 = vld [vmem:[#allocation2 + $0x68] sm:$0xff]  ;;  %s1129_s23 = sshll.u32 %s1372_s5, 4  ;;  %vm1120_vm8 = vcmask 9216   ;;  %s1130_s23 = int_to_ptr.hbm [resolvable:$true] %s1129_s23 }
  0x10   :  { %v121_v2 = vld [vmem:[#allocation2 + $0x178] sm:$0xff]  ;;  %539 = vmatpush.msra.mxu1 %v105_v1  ;;  %v120_v5 = vld [vmem:[#allocation2 + $0x170] sm:$0xff]  ;;  %v103_v8 = vld [vmem:[#allocation2 + $0xe8] sm:$0xff] }
  0x11   :  { %559 = vmatpush.msra.mxu2 %v121_v2  ;;  %v137_v6 = vld [vmem:[#allocation2 + $0x1f8] sm:$0xff]  ;;  %520 = vmatpush.msra.mxu0 %v88_v3  ;;  %v119_v9 = vld [vmem:[#allocation2 + $0x168] sm:$0xff]  ;;  %v136_v10 = vld [vmem:[#allocation2 + $0x1f0] sm:$0xff] }
  0x12   :  { %540 = vmatpush.msra.mxu1 %v104_v4  ;;  %579 = vmatpush.msra.mxu3 %v137_v6  ;;  %v86_v11 = vld [vmem:[#allocation2 + $0x60] sm:$0xff]  ;;  %v135_v14 = vld [vmem:[#allocation2 + $0x1e8] sm:$0xff]  ;;  %v85_v15 = vld [vmem:[#allocation2 + $0x58] sm:$0xff] }
  0x13   :  { %560 = vmatpush.msra.mxu2 %v120_v5  ;;  %v102_v12 = vld [vmem:[#allocation2 + $0xe0] sm:$0xff]  ;;  %521 = vmatpush.msra.mxu0 %v87_v7  ;;  %v101_v16 = vld [vmem:[#allocation2 + $0xd8] sm:$0xff]  ;;  %v84_v19 = vld [vmem:[#allocation2 + $0x50] sm:$0xff] }
  0x14   :  { %541 = vmatpush.msra.mxu1 %v103_v8  ;;  %v118_v13 = vld [vmem:[#allocation2 + $0x160] sm:$0xff]  ;;  %580 = vmatpush.msra.mxu3 %v136_v10  ;;  %v117_v17 = vld [vmem:[#allocation2 + $0x158] sm:$0xff]  ;;  %v100_v20 = vld [vmem:[#allocation2 + $0xd0] sm:$0xff] }
  0x15   :  { %561 = vmatpush.msra.mxu2 %v119_v9  ;;  %522 = vmatpush.msra.mxu0 %v86_v11  ;;  %v134_v18 = vld [vmem:[#allocation2 + $0x1e0] sm:$0xff]  ;;  %v116_v21 = vld [vmem:[#allocation2 + $0x150] sm:$0xff]  ;;  %v133_v22 = vld [vmem:[#allocation2 + $0x1d8] sm:$0xff] }
  0x16   :  { %542 = vmatpush.msra.mxu1 %v102_v12  ;;  %581 = vmatpush.msra.mxu3 %v135_v14  ;;  %v83_v23 = vld [vmem:[#allocation2 + $0x48] sm:$0xff]  ;;  %v132_v26 = vld [vmem:[#allocation2 + $0x1d0] sm:$0xff]  ;;  %v82_v27 = vld [vmem:[#allocation2 + $0x40] sm:$0xff] }
  0x17   :  { %562 = vmatpush.msra.mxu2 %v118_v13  ;;  %523 = vmatpush.msra.mxu0 %v85_v15  ;;  %v99_v24 = vld [vmem:[#allocation2 + $0xc8] sm:$0xff]  ;;  %v98_v28 = vld [vmem:[#allocation2 + $0xc0] sm:$0xff]  ;;  %v81_v31 = vld [vmem:[#allocation2 + $0x38] sm:$0xff] }
  0x18   :  { %543 = vmatpush.msra.mxu1 %v101_v16  ;;  %582 = vmatpush.msra.mxu3 %v134_v18  ;;  %v115_v25 = vld [vmem:[#allocation2 + $0x148] sm:$0xff]  ;;  %v114_v29 = vld [vmem:[#allocation2 + $0x140] sm:$0xff]  ;;  %v97_v32 = vld [vmem:[#allocation2 + $0xb8] sm:$0xff] }
  0x19   :  { %563 = vmatpush.msra.mxu2 %v117_v17  ;;  %524 = vmatpush.msra.mxu0 %v84_v19  ;;  %v131_v30 = vld [vmem:[#allocation2 + $0x1c8] sm:$0xff]  ;;  %v113_v33 = vld [vmem:[#allocation2 + $0x138] sm:$0xff]  ;;  %v130_v34 = vld [vmem:[#allocation2 + $0x1c0] sm:$0xff] }
  0x1a   :  { %544 = vmatpush.msra.mxu1 %v100_v20  ;;  %583 = vmatpush.msra.mxu3 %v133_v22  ;;  %v80_v35 = vld [vmem:[#allocation2 + $0x30] sm:$0xff]  ;;  %v129_v38 = vld [vmem:[#allocation2 + $0x1b8] sm:$0xff]  ;;  %v79_v39 = vld [vmem:[#allocation2 + $0x28] sm:$0xff] }
  0x1b   :  { %564 = vmatpush.msra.mxu2 %v116_v21  ;;  %525 = vmatpush.msra.mxu0 %v83_v23  ;;  %v96_v36 = vld [vmem:[#allocation2 + $0xb0] sm:$0xff]  ;;  %v95_v40 = vld [vmem:[#allocation2 + $0xa8] sm:$0xff]  ;;  %v78_v43 = vld [vmem:[#allocation2 + $0x20] sm:$0xff] }
  0x1c   :  { %545 = vmatpush.msra.mxu1 %v99_v24  ;;  %584 = vmatpush.msra.mxu3 %v132_v26  ;;  %v112_v37 = vld [vmem:[#allocation2 + $0x130] sm:$0xff]  ;;  %v111_v41 = vld [vmem:[#allocation2 + $0x128] sm:$0xff]  ;;  %v94_v44 = vld [vmem:[#allocation2 + $0xa0] sm:$0xff] }
  0x1d   :  { %565 = vmatpush.msra.mxu2 %v115_v25  ;;  %526 = vmatpush.msra.mxu0 %v82_v27  ;;  %v128_v42 = vld [vmem:[#allocation2 + $0x1b0] sm:$0xff]  ;;  %v110_v45 = vld [vmem:[#allocation2 + $0x120] sm:$0xff]  ;;  %v127_v46 = vld [vmem:[#allocation2 + $0x1a8] sm:$0xff] }
  0x1e   :  { %546 = vmatpush.msra.mxu1 %v98_v28  ;;  %585 = vmatpush.msra.mxu3 %v131_v30  ;;  %v77_v47 = vld [vmem:[#allocation2 + $0x18] sm:$0xff]  ;;  %v126_v50 = vld [vmem:[#allocation2 + $0x1a0] sm:$0xff]  ;;  %v76_v51 = vld [vmem:[#allocation2 + $0x10] sm:$0xff] }
  0x1f   :  { %566 = vmatpush.msra.mxu2 %v114_v29  ;;  %527 = vmatpush.msra.mxu0 %v81_v31  ;;  %v93_v48 = vld [vmem:[#allocation2 + $0x98] sm:$0xff]  ;;  %v92_v52 = vld [vmem:[#allocation2 + $0x90] sm:$0xff]  ;;  %v75_v55 = vld [vmem:[#allocation2 + $0x8] sm:$0xff] }
  0x20   :  { %547 = vmatpush.msra.mxu1 %v97_v32  ;;  %586 = vmatpush.msra.mxu3 %v130_v34  ;;  %v109_v49 = vld [vmem:[#allocation2 + $0x118] sm:$0xff]  ;;  %v108_v53 = vld [vmem:[#allocation2 + $0x110] sm:$0xff]  ;;  %v91_v56 = vld [vmem:[#allocation2 + $0x88] sm:$0xff] }
  0x21   :  { %567 = vmatpush.msra.mxu2 %v113_v33  ;;  %528 = vmatpush.msra.mxu0 %v80_v35  ;;  %v125_v54 = vld [vmem:[#allocation2 + $0x198] sm:$0xff]  ;;  %v107_v57 = vld [vmem:[#allocation2 + $0x108] sm:$0xff]  ;;  %v124_v58 = vld [vmem:[#allocation2 + $0x190] sm:$0xff] }
  0x22   :  { %548 = vmatpush.msra.mxu1 %v96_v36  ;;  %587 = vmatpush.msra.mxu3 %v129_v38  ;;  %v74_v59 = vld [vmem:[#allocation2] sm:$0xff]  ;;  %v123_v62 = vld [vmem:[#allocation2 + $0x188] sm:$0xff]  ;;  %v153_v63 = vld [vmem:[#allocation2 + $0x278] sm:$0xff] }
  0x23   :  { %568 = vmatpush.msra.mxu2 %v112_v37  ;;  %529 = vmatpush.msra.mxu0 %v79_v39  ;;  %v90_v60 = vld [vmem:[#allocation2 + $0x80] sm:$0xff]  ;;  %v169_v0 = vld [vmem:[#allocation2 + $0x2f8] sm:$0xff]  ;;  %v152_v3 = vld [vmem:[#allocation2 + $0x270] sm:$0xff] }
  0x24   :  { %549 = vmatpush.msra.mxu1 %v95_v40  ;;  %588 = vmatpush.msra.mxu3 %v128_v42  ;;  %v106_v61 = vld [vmem:[#allocation2 + $0x100] sm:$0xff]  ;;  %v185_v1 = vld [vmem:[#allocation2 + $0x378] sm:$0xff]  ;;  %v168_v4 = vld [vmem:[#allocation2 + $0x2f0] sm:$0xff] }
  0x25   :  { %569 = vmatpush.msra.mxu2 %v111_v41  ;;  %530 = vmatpush.msra.mxu0 %v78_v43  ;;  %v122_v2 = vld [vmem:[#allocation2 + $0x180] sm:$0xff]  ;;  %v184_v5 = vld [vmem:[#allocation2 + $0x370] sm:$0xff]  ;;  %v201_v6 = vld [vmem:[#allocation2 + $0x3f8] sm:$0xff] }
  0x26   :  { %550 = vmatpush.msra.mxu1 %v94_v44  ;;  %589 = vmatpush.msra.mxu3 %v127_v46  ;;  %v151_v7 = vld [vmem:[#allocation2 + $0x268] sm:$0xff]  ;;  %v200_v10 = vld [vmem:[#allocation2 + $0x3f0] sm:$0xff]  ;;  %v150_v11 = vld [vmem:[#allocation2 + $0x260] sm:$0xff] }
  0x27   :  { %570 = vmatpush.msra.mxu2 %v110_v45  ;;  %531 = vmatpush.msra.mxu0 %v77_v47  ;;  %v167_v8 = vld [vmem:[#allocation2 + $0x2e8] sm:$0xff]  ;;  %v166_v12 = vld [vmem:[#allocation2 + $0x2e0] sm:$0xff]  ;;  %v149_v15 = vld [vmem:[#allocation2 + $0x258] sm:$0xff] }
  0x28   :  { %551 = vmatpush.msra.mxu1 %v93_v48  ;;  %590 = vmatpush.msra.mxu3 %v126_v50  ;;  %v183_v9 = vld [vmem:[#allocation2 + $0x368] sm:$0xff]  ;;  %v182_v13 = vld [vmem:[#allocation2 + $0x360] sm:$0xff]  ;;  %v165_v16 = vld [vmem:[#allocation2 + $0x2d8] sm:$0xff] }
  0x29   :  { %571 = vmatpush.msra.mxu2 %v109_v49  ;;  %532 = vmatpush.msra.mxu0 %v76_v51  ;;  %v199_v14 = vld [vmem:[#allocation2 + $0x3e8] sm:$0xff]  ;;  %v181_v17 = vld [vmem:[#allocation2 + $0x358] sm:$0xff]  ;;  %v198_v18 = vld [vmem:[#allocation2 + $0x3e0] sm:$0xff] }
  0x2a   :  { %552 = vmatpush.msra.mxu1 %v92_v52  ;;  %591 = vmatpush.msra.mxu3 %v125_v54  ;;  %v148_v19 = vld [vmem:[#allocation2 + $0x250] sm:$0xff]  ;;  %v197_v22 = vld [vmem:[#allocation2 + $0x3d8] sm:$0xff]  ;;  %v147_v24 = vld [vmem:[#allocation2 + $0x248] sm:$0xff] }
  0x2b   :  { %572 = vmatpush.msra.mxu2 %v108_v53  ;;  %533 = vmatpush.msra.mxu0 %v75_v55  ;;  %v164_v20 = vld [vmem:[#allocation2 + $0x2d0] sm:$0xff]  ;;  %v68_v23 = vld [vmem:[%s1367_s0] sm:$0xff]  ;;  %v163_v25 = vld [vmem:[#allocation2 + $0x2c8] sm:$0xff] }
  0x2c   :  { %553 = vmatpush.msra.mxu1 %v91_v56  ;;  %592 = vmatpush.msra.mxu3 %v124_v58  ;;  %v180_v21 = vld [vmem:[#allocation2 + $0x350] sm:$0xff]  ;;  %464 = vst [vmem:[#allocation1] ss:$4 sm:$0xff] %v68_v23  ;;  %v179_v26 = vld [vmem:[#allocation2 + $0x348] sm:$0xff]  ;;  %v146_v28 = vld [vmem:[#allocation2 + $0x240] sm:$0xff] }
  0x2d   :  { %573 = vmatpush.msra.mxu2 %v107_v57  ;;  %534 = vmatpush.msra.mxu0 %v74_v59  ;;  %v196_v27 = vld [vmem:[#allocation2 + $0x3d0] sm:$0xff]  ;;  %v162_v29 = vld [vmem:[#allocation2 + $0x2c0] sm:$0xff]  ;;  %v195_v31 = vld [vmem:[#allocation2 + $0x3c8] sm:$0xff] }
  0x2e   :  { %554 = vmatpush.msra.mxu1 %v90_v60  ;;  %593 = vmatpush.msra.mxu3 %v123_v62  ;;  %v178_v30 = vld [vmem:[#allocation2 + $0x340] sm:$0xff]  ;;  %v145_v32 = vld [vmem:[#allocation2 + $0x238] sm:$0xff]  ;;  %v144_v36 = vld [vmem:[#allocation2 + $0x230] sm:$0xff] }
  0x2f   :  { %574 = vmatpush.msra.mxu2 %v106_v61  ;;  %599 = vmatpush.msrb.mxu0 %v153_v63  ;;  %v161_v33 = vld [vmem:[#allocation2 + $0x2b8] sm:$0xff]  ;;  %v194_v35 = vld [vmem:[#allocation2 + $0x3c0] sm:$0xff]  ;;  %v160_v37 = vld [vmem:[#allocation2 + $0x2b0] sm:$0xff] }
  0x30   :  { %619 = vmatpush.msrb.mxu1 %v169_v0  ;;  %594 = vmatpush.msra.mxu3 %v122_v2  ;;  %v177_v34 = vld [vmem:[#allocation2 + $0x338] sm:$0xff]  ;;  %v176_v38 = vld [vmem:[#allocation2 + $0x330] sm:$0xff]  ;;  %v69_v40 = vld [vmem:[%s1367_s0 + $0x8] sm:$0xff] }
  0x31   :  { %639 = vmatpush.msrb.mxu2 %v185_v1  ;;  %600 = vmatpush.msrb.mxu0 %v152_v3  ;;  %v193_v39 = vld [vmem:[#allocation2 + $0x3b8] sm:$0xff]  ;;  %v143_v41 = vld [vmem:[#allocation2 + $0x228] sm:$0xff]  ;;  %466 = vst [vmem:[#allocation1 + $0x20] ss:$4 sm:$0xff] %v69_v40  ;;  %v192_v49 = vld [vmem:[#allocation2 + $0x3b0] sm:$0xff] }
  0x32   :  { %620 = vmatpush.msrb.mxu1 %v168_v4  ;;  %659 = vmatpush.msrb.mxu3 %v201_v6  ;;  %v159_v42 = vld [vmem:[#allocation2 + $0x2a8] sm:$0xff]  ;;  %v142_v50 = vld [vmem:[#allocation2 + $0x220] sm:$0xff]  ;;  %v141_v54 = vld [vmem:[#allocation2 + $0x218] sm:$0xff] }
  0x33   :  { %640 = vmatpush.msrb.mxu2 %v184_v5  ;;  %601 = vmatpush.msrb.mxu0 %v151_v7  ;;  %v70_v43 = vld [vmem:[%s1367_s0 + $0x10] sm:$0xff]  ;;  %v1307_v46 = vld.sshfl [vmem:[#allocation1] sm:$0xff pattern:$0x73625140]  ;;  %v158_v51 = vld [vmem:[#allocation2 + $0x2a0] sm:$0xff] }
  0x34   :  { %621 = vmatpush.msrb.mxu1 %v167_v8  ;;  %660 = vmatpush.msrb.mxu3 %v200_v10  ;;  %v175_v44 = vld [vmem:[#allocation2 + $0x328] sm:$0xff]  ;;  %v1309_v47 = vld.sshfl [vmem:[#allocation1 + $0x8] sm:$0xff pattern:$0x73625140]  ;;  %v157_v55 = vld [vmem:[#allocation2 + $0x298] sm:$0xff] }
  0x35   :  { %641 = vmatpush.msrb.mxu2 %v183_v9  ;;  %602 = vmatpush.msrb.mxu0 %v150_v11  ;;  %v469_v45 = vld.sshfl [vmem:[#allocation1 + $0x10] sm:$0xff pattern:$0x73625140]  ;;  %v1311_v48 = vld.sshfl [vmem:[#allocation1 + $0x18] sm:$0xff pattern:$0x73625140] }
  0x36   :  { %622 = vmatpush.msrb.mxu1 %v166_v12  ;;  %661 = vmatpush.msrb.mxu3 %v199_v14  ;;  %475 = vst [vmem:[#allocation1] ss:$4 sm:$0xff] %v70_v43  ;;  %v174_v52 = vld [vmem:[#allocation2 + $0x320] sm:$0xff]  ;;  %v191_v53 = vld [vmem:[#allocation2 + $0x3a8] sm:$0xff]  ;;  %v173_v56 = vld [vmem:[#allocation2 + $0x318] sm:$0xff] }
  0x37   :  { %642 = vmatpush.msrb.mxu2 %v182_v13  ;;  %603 = vmatpush.msrb.mxu0 %v149_v15  ;;  %v190_v57 = vld [vmem:[#allocation2 + $0x3a0] sm:$0xff]  ;;  %v140_v58 = vld [vmem:[#allocation2 + $0x210] sm:$0xff]  ;;  %v189_v2 = vld [vmem:[#allocation2 + $0x398] sm:$0xff] }
  0x38   :  { %623 = vmatpush.msrb.mxu1 %v165_v16  ;;  %662 = vmatpush.msrb.mxu3 %v198_v18  ;;  %v156_v59 = vld [vmem:[#allocation2 + $0x290] sm:$0xff]  ;;  %v1316_v61 = vld.sshfl [vmem:[#allocation1 + $0x30] sm:$0xff pattern:$0x73625140]  ;;  %v138_v7 = vld [vmem:[#allocation2 + $0x200] sm:$0xff] }
  0x39   :  { %643 = vmatpush.msrb.mxu2 %v181_v17  ;;  %604 = vmatpush.msrb.mxu0 %v148_v19  ;;  %v71_v60 = vld [vmem:[%s1367_s0 + $0x18] sm:$0xff]  ;;  %v1318_v62 = vld.sshfl [vmem:[#allocation1 + $0x20] sm:$0xff pattern:$0x73625140]  ;;  %v139_v3 = vld [vmem:[#allocation2 + $0x208] sm:$0xff] }
  0x3a   :  { %624 = vmatpush.msrb.mxu1 %v164_v20  ;;  %663 = vmatpush.msrb.mxu3 %v197_v22  ;;  %v1320_v63 = vld.sshfl [vmem:[#allocation1 + $0x38] sm:$0xff pattern:$0x73625140]  ;;  %v1322_v0 = vld.sshfl [vmem:[#allocation1 + $0x28] sm:$0xff pattern:$0x73625140] }
  0x3b   :  { %644 = vmatpush.msrb.mxu2 %v180_v21  ;;  %605 = vmatpush.msrb.mxu0 %v147_v24  ;;  %v172_v1 = vld [vmem:[#allocation2 + $0x310] sm:$0xff]  ;;  %476 = vst [vmem:[#allocation1 + $0x20] ss:$4 sm:$0xff] %v71_v60  ;;  %v155_v4 = vld [vmem:[#allocation2 + $0x288] sm:$0xff]  ;;  %v154_v8 = vld [vmem:[#allocation2 + $0x280] sm:$0xff] }
  0x3c   :  { %625 = vmatpush.msrb.mxu1 %v163_v25  ;;  %664 = vmatpush.msrb.mxu3 %v196_v27  ;;  %v171_v5 = vld [vmem:[#allocation2 + $0x308] sm:$0xff]  ;;  %v188_v6 = vld [vmem:[#allocation2 + $0x390] sm:$0xff]  ;;  %v170_v9 = vld [vmem:[#allocation2 + $0x300] sm:$0xff] }
  0x3d   :  { %645 = vmatpush.msrb.mxu2 %v179_v26  ;;  %606 = vmatpush.msrb.mxu0 %v146_v28  ;;  %v187_v10 = vld [vmem:[#allocation2 + $0x388] sm:$0xff]  ;;  %v217_v11 = vld [vmem:[#allocation2 + $0x478] sm:$0xff]  ;;  %v186_v14 = vld [vmem:[#allocation2 + $0x380] sm:$0xff] }
  0x3e   :  { %626 = vmatpush.msrb.mxu1 %v162_v29  ;;  %665 = vmatpush.msrb.mxu3 %v195_v31  ;;  %v233_v12 = vld [vmem:[#allocation2 + $0x4f8] sm:$0xff]  ;;  %v216_v15 = vld [vmem:[#allocation2 + $0x470] sm:$0xff]  ;;  %v215_v19 = vld [vmem:[#allocation2 + $0x468] sm:$0xff] }
  0x3f   :  { %646 = vmatpush.msrb.mxu2 %v178_v30  ;;  %607 = vmatpush.msrb.mxu0 %v145_v32  ;;  %v249_v13 = vld [vmem:[#allocation2 + $0x578] sm:$0xff]  ;;  %v232_v16 = vld [vmem:[#allocation2 + $0x4f0] sm:$0xff]  ;;  %v231_v20 = vld [vmem:[#allocation2 + $0x4e8] sm:$0xff] }
  0x40   :  { %627 = vmatpush.msrb.mxu1 %v161_v33  ;;  %666 = vmatpush.msrb.mxu3 %v194_v35  ;;  %v248_v17 = vld [vmem:[#allocation2 + $0x570] sm:$0xff]  ;;  %v265_v18 = vld [vmem:[#allocation2 + $0x5f8] sm:$0xff]  ;;  %v247_v21 = vld [vmem:[#allocation2 + $0x568] sm:$0xff] }
  0x41   :  { %647 = vmatpush.msrb.mxu2 %v177_v34  ;;  %608 = vmatpush.msrb.mxu0 %v144_v36  ;;  %v264_v22 = vld [vmem:[#allocation2 + $0x5f0] sm:$0xff]  ;;  %v214_v23 = vld [vmem:[#allocation2 + $0x460] sm:$0xff]  ;;  %v1327_v26 = vld.sshfl [vmem:[#allocation1] sm:$0xff pattern:$0x73625140] }
  0x42   :  { %628 = vmatpush.msrb.mxu1 %v160_v37  ;;  %667 = vmatpush.msrb.mxu3 %v193_v39  ;;  %v230_v24 = vld [vmem:[#allocation2 + $0x4e0] sm:$0xff]  ;;  %v1329_v27 = vld.sshfl [vmem:[#allocation1 + $0x10] sm:$0xff pattern:$0x73625140]  ;;  %v72_v30 = vld [vmem:[%s1367_s0 + $0x20] sm:$0xff] }
  0x43   :  { %648 = vmatpush.msrb.mxu2 %v176_v38  ;;  %609 = vmatpush.msrb.mxu0 %v143_v41  ;;  %v246_v25 = vld [vmem:[#allocation2 + $0x560] sm:$0xff]  ;;  %v263_v29 = vld [vmem:[#allocation2 + $0x5e8] sm:$0xff]  ;;  %v1336_v31 = vld.sshfl [vmem:[#allocation1 + $0x18] sm:$0xff pattern:$0x73625140] }
  0x44   :  { %629 = vmatpush.msrb.mxu1 %v159_v42  ;;  %668 = vmatpush.msrb.mxu3 %v192_v49  ;;  %v1331_v28 = vld.sshfl [vmem:[#allocation1 + $0x8] sm:$0xff pattern:$0x73625140]  ;;  %v213_v32 = vld [vmem:[#allocation2 + $0x458] sm:$0xff]  ;;  %v212_v36 = vld [vmem:[#allocation2 + $0x450] sm:$0xff] }
  0x45   :  { %649 = vmatpush.msrb.mxu2 %v175_v44  ;;  %610 = vmatpush.msrb.mxu0 %v142_v50  ;;  %485 = vst [vmem:[#allocation1] ss:$4 sm:$0xff] %v72_v30  ;;  %v229_v33 = vld [vmem:[#allocation2 + $0x4d8] sm:$0xff]  ;;  %v262_v35 = vld [vmem:[#allocation2 + $0x5e0] sm:$0xff]  ;;  %v228_v37 = vld [vmem:[#allocation2 + $0x4d0] sm:$0xff] }
  0x46   :  { %630 = vmatpush.msrb.mxu1 %v158_v51  ;;  %669 = vmatpush.msrb.mxu3 %v191_v53  ;;  %v245_v34 = vld [vmem:[#allocation2 + $0x558] sm:$0xff]  ;;  %v244_v38 = vld [vmem:[#allocation2 + $0x550] sm:$0xff]  ;;  %v211_v40 = vld [vmem:[#allocation2 + $0x448] sm:$0xff] }
  0x47   :  { %650 = vmatpush.msrb.mxu2 %v174_v52  ;;  %611 = vmatpush.msrb.mxu0 %v141_v54  ;;  %v261_v39 = vld [vmem:[#allocation2 + $0x5d8] sm:$0xff]  ;;  %v227_v41 = vld [vmem:[#allocation2 + $0x4c8] sm:$0xff]  ;;  %v260_v43 = vld [vmem:[#allocation2 + $0x5d0] sm:$0xff] }
  0x48   :  { %631 = vmatpush.msrb.mxu1 %v157_v55  ;;  %670 = vmatpush.msrb.mxu3 %v190_v57  ;;  %v243_v42 = vld [vmem:[#allocation2 + $0x548] sm:$0xff]  ;;  %v210_v44 = vld [vmem:[#allocation2 + $0x440] sm:$0xff]  ;;  %v225_v49 = vld [vmem:[#allocation2 + $0x4b8] sm:$0xff] }
  0x49   :  { %651 = vmatpush.msrb.mxu2 %v173_v56  ;;  %612 = vmatpush.msrb.mxu0 %v140_v58  ;;  %v241_v50 = vld [vmem:[#allocation2 + $0x538] sm:$0xff]  ;;  %v258_v51 = vld [vmem:[#allocation2 + $0x5c0] sm:$0xff]  ;;  %v208_v52 = vld [vmem:[#allocation2 + $0x430] sm:$0xff] }
  0x4a   :  { %632 = vmatpush.msrb.mxu1 %v156_v59  ;;  %671 = vmatpush.msrb.mxu3 %v189_v2  ;;  %v224_v53 = vld [vmem:[#allocation2 + $0x4b0] sm:$0xff]  ;;  %v257_v55 = vld [vmem:[#allocation2 + $0x5b8] sm:$0xff]  ;;  %v207_v56 = vld [vmem:[#allocation2 + $0x428] sm:$0xff] }
  0x4b   :  { %652 = vmatpush.msrb.mxu2 %v172_v1  ;;  %613 = vmatpush.msrb.mxu0 %v139_v3  ;;  %v240_v54 = vld [vmem:[#allocation2 + $0x530] sm:$0xff]  ;;  %v223_v57 = vld [vmem:[#allocation2 + $0x4a8] sm:$0xff]  ;;  %v206_v60 = vld [vmem:[#allocation2 + $0x420] sm:$0xff] }
  0x4c   :  { %633 = vmatpush.msrb.mxu1 %v155_v4  ;;  %672 = vmatpush.msrb.mxu3 %v188_v6  ;;  %v239_v58 = vld [vmem:[#allocation2 + $0x528] sm:$0xff]  ;;  %v256_v59 = vld [vmem:[#allocation2 + $0x5b0] sm:$0xff]  ;;  %v221_v1 = vld [vmem:[#allocation2 + $0x498] sm:$0xff] }
  0x4d   :  { %653 = vmatpush.msrb.mxu2 %v171_v5  ;;  %614 = vmatpush.msrb.mxu0 %v138_v7  ;;  %v237_v2 = vld [vmem:[#allocation2 + $0x518] sm:$0xff]  ;;  %v254_v3 = vld [vmem:[#allocation2 + $0x5a0] sm:$0xff]  ;;  %v204_v4 = vld [vmem:[#allocation2 + $0x410] sm:$0xff] }
  0x4e   :  { %575 = vmatmul.f32.vlgmr.msra.gmra.mxu2 %v469_v45  ;;  %634 = vmatpush.msrb.mxu1 %v154_v8  ;;  %v226_v45 = vld [vmem:[#allocation2 + $0x4c0] sm:$0xff]  ;;  %v220_v5 = vld [vmem:[#allocation2 + $0x490] sm:$0xff]  ;;  %v253_v7 = vld [vmem:[#allocation2 + $0x598] sm:$0xff] }
  0x4f   :  { %654 = vmatpush.msrb.mxu2 %v170_v9  ;;  %673 = vmatpush.msrb.mxu3 %v187_v10  ;;  %v236_v6 = vld [vmem:[#allocation2 + $0x510] sm:$0xff]  ;;  %v203_v8 = vld [vmem:[#allocation2 + $0x408] sm:$0xff] }
  0x50   :  { %535 = vmatmul.f32.vlgmr.msra.gmra.mxu0 %v1307_v46  ;;  %555 = vmatmul.f32.vlgmr.msra.gmra.mxu1 %v1309_v47  ;;  %v242_v46 = vld [vmem:[#allocation2 + $0x540] sm:$0xff]  ;;  %v259_v47 = vld [vmem:[#allocation2 + $0x5c8] sm:$0xff]  ;;  %v328_v30 = vld [vmem:[#allocation2 + $0x7f0] sm:$0xff] }
  0x51   :  { %595 = vmatmul.f32.vlgmr.msra.gmra.mxu3 %v1311_v48  ;;  %679 = vmatpush.msra.mxu0 %v217_v11  ;;  %v209_v48 = vld [vmem:[#allocation2 + $0x438] sm:$0xff]  ;;  %v219_v9 = vld [vmem:[#allocation2 + $0x488] sm:$0xff]  ;;  %v252_v11 = vld [vmem:[#allocation2 + $0x590] sm:$0xff] }
  0x52   :  { %699 = vmatpush.msra.mxu1 %v233_v12  ;;  %719 = vmatpush.msra.mxu2 %v249_v13  ;;  %v235_v10 = vld [vmem:[#allocation2 + $0x508] sm:$0xff]  ;;  %v202_v12 = vld [vmem:[#allocation2 + $0x400] sm:$0xff] }
  0x53   :  { %674 = vmatpush.msrb.mxu3 %v186_v14  ;;  %680 = vmatpush.msra.mxu0 %v216_v15  ;;  %v218_v13 = vld [vmem:[#allocation2 + $0x480] sm:$0xff]  ;;  %v251_v15 = vld [vmem:[#allocation2 + $0x588] sm:$0xff] }
  0x54   :  { %700 = vmatpush.msra.mxu1 %v232_v16  ;;  %720 = vmatpush.msra.mxu2 %v248_v17  ;;  %v234_v14 = vld [vmem:[#allocation2 + $0x500] sm:$0xff]  ;;  %v281_v16 = vld [vmem:[#allocation2 + $0x678] sm:$0xff] }
  0x55   :  { %739 = vmatpush.msra.mxu3 %v265_v18  ;;  %681 = vmatpush.msra.mxu0 %v215_v19  ;;  %v297_v17 = vld [vmem:[#allocation2 + $0x6f8] sm:$0xff]  ;;  %v250_v19 = vld [vmem:[#allocation2 + $0x580] sm:$0xff] }
  0x56   :  { %701 = vmatpush.msra.mxu1 %v231_v20  ;;  %721 = vmatpush.msra.mxu2 %v247_v21  ;;  %v313_v18 = vld [vmem:[#allocation2 + $0x778] sm:$0xff]  ;;  %v280_v20 = vld [vmem:[#allocation2 + $0x670] sm:$0xff] }
  0x57   :  { %740 = vmatpush.msra.mxu3 %v264_v22  ;;  %655 = vmatmul.f32.vlgmr.msrb.gmra.mxu2 %v1316_v61  ;;  %v222_v61 = vld [vmem:[#allocation2 + $0x4a0] sm:$0xff]  ;;  %v296_v21 = vld [vmem:[#allocation2 + $0x6f0] sm:$0xff] }
  0x58   :  { %682 = vmatpush.msra.mxu0 %v214_v23  ;;  %702 = vmatpush.msra.mxu1 %v230_v24  ;;  %v312_v22 = vld [vmem:[#allocation2 + $0x770] sm:$0xff]  ;;  %v329_v23 = vld [vmem:[#allocation2 + $0x7f8] sm:$0xff]  ;;  %v279_v24 = vld [vmem:[#allocation2 + $0x668] sm:$0xff] }
  0x59   :  { %722 = vmatpush.msra.mxu2 %v246_v25  ;;  %741 = vmatpush.msra.mxu3 %v263_v29  ;;  %v295_v25 = vld [vmem:[#allocation2 + $0x6e8] sm:$0xff] }
  0x5a   :  { %615 = vmatmul.f32.vlgmr.msrb.gmra.mxu0 %v1318_v62  ;;  %675 = vmatmul.f32.vlgmr.msrb.gmra.mxu3 %v1320_v63  ;;  %v238_v62 = vld [vmem:[#allocation2 + $0x520] sm:$0xff]  ;;  %v255_v63 = vld [vmem:[#allocation2 + $0x5a8] sm:$0xff] }
  0x5b   :  { %683 = vmatpush.msra.mxu0 %v213_v32  ;;  %703 = vmatpush.msra.mxu1 %v229_v33  ;;  %v311_v29 = vld [vmem:[#allocation2 + $0x768] sm:$0xff]  ;;  %v278_v32 = vld [vmem:[#allocation2 + $0x660] sm:$0xff] }
  0x5c   :  { %723 = vmatpush.msra.mxu2 %v245_v34  ;;  %742 = vmatpush.msra.mxu3 %v262_v35  ;;  %v1350_v33 = vld.sshfl [vmem:[#allocation1 + $0x28] sm:$0xff pattern:$0x73625140] }
  0x5d   :  { %635 = vmatmul.f32.vlgmr.msrb.gmra.mxu1 %v1322_v0  ;;  %684 = vmatpush.msra.mxu0 %v212_v36  ;;  %v205_v0 = vld [vmem:[#allocation2 + $0x418] sm:$0xff]  ;;  %v294_v34 = vld [vmem:[#allocation2 + $0x6e0] sm:$0xff]  ;;  %v327_v36 = vld [vmem:[#allocation2 + $0x7e8] sm:$0xff] }
  0x5e   :  { %704 = vmatpush.msra.mxu1 %v228_v37  ;;  %724 = vmatpush.msra.mxu2 %v244_v38  ;;  %v73_v35 = vld [vmem:[%s1367_s0 + $0x28] sm:$0xff]  ;;  %v277_v37 = vld [vmem:[#allocation2 + $0x658] sm:$0xff] }
  0x5f   :  { %743 = vmatpush.msra.mxu3 %v261_v39  ;;  %685 = vmatpush.msra.mxu0 %v211_v40  ;;  %v293_v38 = vld [vmem:[#allocation2 + $0x6d8] sm:$0xff]  ;;  %v326_v40 = vld [vmem:[#allocation2 + $0x7e0] sm:$0xff] }
  0x60   :  { %705 = vmatpush.msra.mxu1 %v227_v41  ;;  %725 = vmatpush.msra.mxu2 %v243_v42  ;;  %v309_v39 = vld [vmem:[#allocation2 + $0x758] sm:$0xff]  ;;  %v276_v41 = vld [vmem:[#allocation2 + $0x650] sm:$0xff] }
  0x61   :  { %744 = vmatpush.msra.mxu3 %v260_v43  ;;  %686 = vmatpush.msra.mxu0 %v210_v44  ;;  %v292_v42 = vld [vmem:[#allocation2 + $0x6d0] sm:$0xff]  ;;  %v325_v44 = vld [vmem:[#allocation2 + $0x7d8] sm:$0xff] }
  0x62   :  { %706 = vmatpush.msra.mxu1 %v226_v45  ;;  %726 = vmatpush.msra.mxu2 %v242_v46  ;;  %v308_v43 = vld [vmem:[#allocation2 + $0x750] sm:$0xff]  ;;  %v275_v45 = vld [vmem:[#allocation2 + $0x648] sm:$0xff] }
  0x63   :  { %745 = vmatpush.msra.mxu3 %v259_v47  ;;  %687 = vmatpush.msra.mxu0 %v209_v48  ;;  %v291_v46 = vld [vmem:[#allocation2 + $0x6c8] sm:$0xff]  ;;  %v324_v48 = vld [vmem:[#allocation2 + $0x7d0] sm:$0xff] }
  0x64   :  { %707 = vmatpush.msra.mxu1 %v225_v49  ;;  %727 = vmatpush.msra.mxu2 %v241_v50  ;;  %v307_v47 = vld [vmem:[#allocation2 + $0x748] sm:$0xff]  ;;  %v274_v49 = vld [vmem:[#allocation2 + $0x640] sm:$0xff] }
  0x65   :  { %746 = vmatpush.msra.mxu3 %v258_v51  ;;  %688 = vmatpush.msra.mxu0 %v208_v52  ;;  %v290_v50 = vld [vmem:[#allocation2 + $0x6c0] sm:$0xff]  ;;  %v323_v52 = vld [vmem:[#allocation2 + $0x7c8] sm:$0xff] }
  0x66   :  { %708 = vmatpush.msra.mxu1 %v224_v53  ;;  %728 = vmatpush.msra.mxu2 %v240_v54  ;;  %v306_v51 = vld [vmem:[#allocation2 + $0x740] sm:$0xff]  ;;  %v273_v53 = vld [vmem:[#allocation2 + $0x638] sm:$0xff] }
  0x67   :  { %747 = vmatpush.msra.mxu3 %v257_v55  ;;  %689 = vmatpush.msra.mxu0 %v207_v56  ;;  %v289_v54 = vld [vmem:[#allocation2 + $0x6b8] sm:$0xff]  ;;  %v322_v56 = vld [vmem:[#allocation2 + $0x7c0] sm:$0xff] }
  0x68   :  { %709 = vmatpush.msra.mxu1 %v223_v57  ;;  %729 = vmatpush.msra.mxu2 %v239_v58  ;;  %v305_v55 = vld [vmem:[#allocation2 + $0x738] sm:$0xff]  ;;  %v272_v57 = vld [vmem:[#allocation2 + $0x630] sm:$0xff] }
  0x69   :  { %748 = vmatpush.msra.mxu3 %v256_v59  ;;  %690 = vmatpush.msra.mxu0 %v206_v60  ;;  %v288_v58 = vld [vmem:[#allocation2 + $0x6b0] sm:$0xff]  ;;  %v321_v60 = vld [vmem:[#allocation2 + $0x7b8] sm:$0xff] }
  0x6a   :  { %710 = vmatpush.msra.mxu1 %v222_v61  ;;  %730 = vmatpush.msra.mxu2 %v238_v62  ;;  %v304_v59 = vld [vmem:[#allocation2 + $0x730] sm:$0xff]  ;;  %v271_v61 = vld [vmem:[#allocation2 + $0x628] sm:$0xff] }
  0x6b   :  { %749 = vmatpush.msra.mxu3 %v255_v63  ;;  %691 = vmatpush.msra.mxu0 %v205_v0  ;;  %v287_v62 = vld [vmem:[#allocation2 + $0x6a8] sm:$0xff]  ;;  %v320_v0 = vld [vmem:[#allocation2 + $0x7b0] sm:$0xff] }
  0x6c   :  { %711 = vmatpush.msra.mxu1 %v221_v1  ;;  %731 = vmatpush.msra.mxu2 %v237_v2  ;;  %v303_v63 = vld [vmem:[#allocation2 + $0x728] sm:$0xff]  ;;  %v270_v1 = vld [vmem:[#allocation2 + $0x620] sm:$0xff] }
  0x6d   :  { %750 = vmatpush.msra.mxu3 %v254_v3  ;;  %692 = vmatpush.msra.mxu0 %v204_v4  ;;  %v286_v2 = vld [vmem:[#allocation2 + $0x6a0] sm:$0xff]  ;;  %v319_v4 = vld [vmem:[#allocation2 + $0x7a8] sm:$0xff] }
  0x6e   :  { %712 = vmatpush.msra.mxu1 %v220_v5  ;;  %732 = vmatpush.msra.mxu2 %v236_v6  ;;  %v302_v3 = vld [vmem:[#allocation2 + $0x720] sm:$0xff]  ;;  %v269_v5 = vld [vmem:[#allocation2 + $0x618] sm:$0xff] }
  0x6f   :  { %751 = vmatpush.msra.mxu3 %v253_v7  ;;  %693 = vmatpush.msra.mxu0 %v203_v8  ;;  %v285_v6 = vld [vmem:[#allocation2 + $0x698] sm:$0xff]  ;;  %v318_v8 = vld [vmem:[#allocation2 + $0x7a0] sm:$0xff] }
  0x70   :  { %713 = vmatpush.msra.mxu1 %v219_v9  ;;  %733 = vmatpush.msra.mxu2 %v235_v10  ;;  %v301_v7 = vld [vmem:[#allocation2 + $0x718] sm:$0xff]  ;;  %v268_v9 = vld [vmem:[#allocation2 + $0x610] sm:$0xff] }
  0x71   :  { %752 = vmatpush.msra.mxu3 %v252_v11  ;;  %694 = vmatpush.msra.mxu0 %v202_v12  ;;  %v284_v10 = vld [vmem:[#allocation2 + $0x690] sm:$0xff]  ;;  %v317_v12 = vld [vmem:[#allocation2 + $0x798] sm:$0xff] }
  0x72   :  { %714 = vmatpush.msra.mxu1 %v218_v13  ;;  %734 = vmatpush.msra.mxu2 %v234_v14  ;;  %v300_v11 = vld [vmem:[#allocation2 + $0x710] sm:$0xff]  ;;  %v267_v13 = vld [vmem:[#allocation2 + $0x608] sm:$0xff] }
  0x73   :  { %753 = vmatpush.msra.mxu3 %v251_v15  ;;  %695 = vmatmul.f32.vlgmr.msra.gmra.mxu0 %v1327_v26  ;;  %v1346_v26 = vld.sshfl [vmem:[#allocation1 + $0x20] sm:$0xff pattern:$0x73625140]  ;;  %v283_v14 = vld [vmem:[#allocation2 + $0x688] sm:$0xff] }
  0x74   :  { %735 = vmatmul.f32.vlgmr.msra.gmra.mxu2 %v1329_v27  ;;  %759 = vmatpush.msrb.mxu0 %v281_v16  ;;  %v1348_v27 = vld.sshfl [vmem:[#allocation1 + $0x30] sm:$0xff pattern:$0x73625140]  ;;  %v316_v16 = vld [vmem:[#allocation2 + $0x790] sm:$0xff] }
  0x75   :  { %779 = vmatpush.msrb.mxu1 %v297_v17  ;;  %799 = vmatpush.msrb.mxu2 %v313_v18  ;;  %v299_v15 = vld [vmem:[#allocation2 + $0x708] sm:$0xff]  ;;  %v266_v17 = vld [vmem:[#allocation2 + $0x600] sm:$0xff] }
  0x76   :  { %754 = vmatpush.msra.mxu3 %v250_v19  ;;  %715 = vmatmul.f32.vlgmr.msra.gmra.mxu1 %v1331_v28  ;;  %v1355_v28 = vld.sshfl [vmem:[#allocation1 + $0x38] sm:$0xff pattern:$0x73625140]  ;;  %v282_v18 = vld [vmem:[#allocation2 + $0x680] sm:$0xff] }
  0x77   :  { %755 = vmatmul.f32.vlgmr.msra.gmra.mxu3 %v1336_v31  ;;  %760 = vmatpush.msrb.mxu0 %v280_v20  ;;  %v310_v31 = vld [vmem:[#allocation2 + $0x760] sm:$0xff]  ;;  %486 = vst [vmem:[#allocation1 + $0x20] ss:$4 sm:$0xff] %v73_v35  ;;  %v315_v20 = vld [vmem:[#allocation2 + $0x788] sm:$0xff] }
  0x78   :  { %780 = vmatpush.msrb.mxu1 %v296_v21  ;;  %800 = vmatpush.msrb.mxu2 %v312_v22  ;;  %v298_v19 = vld [vmem:[#allocation2 + $0x700] sm:$0xff]  ;;  %v345_v21 = vld [vmem:[#allocation2 + $0x878] sm:$0xff]  ;;  %v359_v35 = vld [vmem:[#allocation2 + $0x8e8] sm:$0xff] }
  0x79   :  { %819 = vmatpush.msrb.mxu3 %v329_v23  ;;  %761 = vmatpush.msrb.mxu0 %v279_v24  ;;  %v361_v22 = vld [vmem:[#allocation2 + $0x8f8] sm:$0xff]  ;;  %v314_v24 = vld [vmem:[#allocation2 + $0x780] sm:$0xff] }
  0x7a   :  { %781 = vmatpush.msrb.mxu1 %v295_v25  ;;  %801 = vmatpush.msrb.mxu2 %v311_v29  ;;  %v377_v23 = vld [vmem:[#allocation2 + $0x978] sm:$0xff]  ;;  %v344_v25 = vld [vmem:[#allocation2 + $0x870] sm:$0xff] }
  0x7b   :  { %820 = vmatpush.msrb.mxu3 %v328_v30  ;;  %762 = vmatpush.msrb.mxu0 %v278_v32  ;;  %v360_v29 = vld [vmem:[#allocation2 + $0x8f0] sm:$0xff]  ;;  %v393_v32 = vld [vmem:[#allocation2 + $0x9f8] sm:$0xff] }
  0x7c   :  { %782 = vmatpush.msrb.mxu1 %v294_v34  ;;  %802 = vmatpush.msrb.mxu2 %v310_v31  ;;  %v376_v30 = vld [vmem:[#allocation2 + $0x970] sm:$0xff]  ;;  %v343_v34 = vld [vmem:[#allocation2 + $0x868] sm:$0xff] }
  0x7d   :  { %821 = vmatpush.msrb.mxu3 %v327_v36  ;;  %763 = vmatpush.msrb.mxu0 %v277_v37  ;;  %v375_v31 = vld [vmem:[#allocation2 + $0x968] sm:$0xff]  ;;  %v358_v36 = vld [vmem:[#allocation2 + $0x8e0] sm:$0xff] }
  0x7e   :  { %783 = vmatpush.msrb.mxu1 %v293_v38  ;;  %803 = vmatpush.msrb.mxu2 %v309_v39  ;;  %v374_v37 = vld [vmem:[#allocation2 + $0x960] sm:$0xff]  ;;  %v391_v38 = vld [vmem:[#allocation2 + $0x9e8] sm:$0xff]  ;;  %v341_v39 = vld [vmem:[#allocation2 + $0x858] sm:$0xff] }
  0x7f   :  { %822 = vmatpush.msrb.mxu3 %v326_v40  ;;  %764 = vmatpush.msrb.mxu0 %v276_v41  ;;  %v390_v40 = vld [vmem:[#allocation2 + $0x9e0] sm:$0xff]  ;;  %v340_v41 = vld [vmem:[#allocation2 + $0x850] sm:$0xff] }
  0x80   :  { %784 = vmatpush.msrb.mxu1 %v292_v42  ;;  %804 = vmatpush.msrb.mxu2 %v308_v43  ;;  %v356_v42 = vld [vmem:[#allocation2 + $0x8d0] sm:$0xff] }
  0x81   :  { %823 = vmatpush.msrb.mxu3 %v325_v44  ;;  %765 = vmatpush.msrb.mxu0 %v275_v45  ;;  %v372_v43 = vld [vmem:[#allocation2 + $0x950] sm:$0xff]  ;;  %v389_v44 = vld [vmem:[#allocation2 + $0x9d8] sm:$0xff]  ;;  %v339_v45 = vld [vmem:[#allocation2 + $0x848] sm:$0xff] }
  0x82   :  { %785 = vmatpush.msrb.mxu1 %v291_v46  ;;  %805 = vmatpush.msrb.mxu2 %v307_v47  ;;  %v355_v46 = vld [vmem:[#allocation2 + $0x8c8] sm:$0xff] }
  0x83   :  { %824 = vmatpush.msrb.mxu3 %v324_v48  ;;  %766 = vmatpush.msrb.mxu0 %v274_v49  ;;  %v371_v47 = vld [vmem:[#allocation2 + $0x948] sm:$0xff]  ;;  %v388_v48 = vld [vmem:[#allocation2 + $0x9d0] sm:$0xff]  ;;  %v338_v49 = vld [vmem:[#allocation2 + $0x840] sm:$0xff] }
  0x84   :  { %786 = vmatpush.msrb.mxu1 %v290_v50  ;;  %806 = vmatpush.msrb.mxu2 %v306_v51  ;;  %v354_v50 = vld [vmem:[#allocation2 + $0x8c0] sm:$0xff] }
  0x85   :  { %825 = vmatpush.msrb.mxu3 %v323_v52  ;;  %767 = vmatpush.msrb.mxu0 %v273_v53  ;;  %v370_v51 = vld [vmem:[#allocation2 + $0x940] sm:$0xff]  ;;  %v387_v52 = vld [vmem:[#allocation2 + $0x9c8] sm:$0xff]  ;;  %v337_v53 = vld [vmem:[#allocation2 + $0x838] sm:$0xff] }
  0x86   :  { %787 = vmatpush.msrb.mxu1 %v289_v54  ;;  %807 = vmatpush.msrb.mxu2 %v305_v55  ;;  %v353_v54 = vld [vmem:[#allocation2 + $0x8b8] sm:$0xff] }
  0x87   :  { %826 = vmatpush.msrb.mxu3 %v322_v56  ;;  %768 = vmatpush.msrb.mxu0 %v272_v57  ;;  %v369_v55 = vld [vmem:[#allocation2 + $0x938] sm:$0xff]  ;;  %v386_v56 = vld [vmem:[#allocation2 + $0x9c0] sm:$0xff]  ;;  %v336_v57 = vld [vmem:[#allocation2 + $0x830] sm:$0xff] }
  0x88   :  { %788 = vmatpush.msrb.mxu1 %v288_v58  ;;  %808 = vmatpush.msrb.mxu2 %v304_v59  ;;  %v352_v58 = vld [vmem:[#allocation2 + $0x8b0] sm:$0xff] }
  0x89   :  { %827 = vmatpush.msrb.mxu3 %v321_v60  ;;  %769 = vmatpush.msrb.mxu0 %v271_v61  ;;  %v368_v59 = vld [vmem:[#allocation2 + $0x930] sm:$0xff]  ;;  %v385_v60 = vld [vmem:[#allocation2 + $0x9b8] sm:$0xff]  ;;  %v335_v61 = vld [vmem:[#allocation2 + $0x828] sm:$0xff] }
  0x8a   :  { %789 = vmatpush.msrb.mxu1 %v287_v62  ;;  %809 = vmatpush.msrb.mxu2 %v303_v63  ;;  %v351_v62 = vld [vmem:[#allocation2 + $0x8a8] sm:$0xff] }
  0x8b   :  { %828 = vmatpush.msrb.mxu3 %v320_v0  ;;  %770 = vmatpush.msrb.mxu0 %v270_v1  ;;  %v367_v63 = vld [vmem:[#allocation2 + $0x928] sm:$0xff]  ;;  %v384_v0 = vld [vmem:[#allocation2 + $0x9b0] sm:$0xff]  ;;  %v334_v1 = vld [vmem:[#allocation2 + $0x820] sm:$0xff] }
  0x8c   :  { %790 = vmatpush.msrb.mxu1 %v286_v2  ;;  %810 = vmatpush.msrb.mxu2 %v302_v3  ;;  %v350_v2 = vld [vmem:[#allocation2 + $0x8a0] sm:$0xff] }
  0x8d   :  { %829 = vmatpush.msrb.mxu3 %v319_v4  ;;  %771 = vmatpush.msrb.mxu0 %v269_v5  ;;  %v366_v3 = vld [vmem:[#allocation2 + $0x920] sm:$0xff]  ;;  %v383_v4 = vld [vmem:[#allocation2 + $0x9a8] sm:$0xff]  ;;  %v333_v5 = vld [vmem:[#allocation2 + $0x818] sm:$0xff] }
  0x8e   :  { %791 = vmatpush.msrb.mxu1 %v285_v6  ;;  %811 = vmatpush.msrb.mxu2 %v301_v7  ;;  %v349_v6 = vld [vmem:[#allocation2 + $0x898] sm:$0xff] }
  0x8f   :  { %830 = vmatpush.msrb.mxu3 %v318_v8  ;;  %772 = vmatpush.msrb.mxu0 %v268_v9  ;;  %v365_v7 = vld [vmem:[#allocation2 + $0x918] sm:$0xff]  ;;  %v382_v8 = vld [vmem:[#allocation2 + $0x9a0] sm:$0xff]  ;;  %v332_v9 = vld [vmem:[#allocation2 + $0x810] sm:$0xff] }
  0x90   :  { %792 = vmatpush.msrb.mxu1 %v284_v10  ;;  %812 = vmatpush.msrb.mxu2 %v300_v11  ;;  %v348_v10 = vld [vmem:[#allocation2 + $0x890] sm:$0xff] }
  0x91   :  { %831 = vmatpush.msrb.mxu3 %v317_v12  ;;  %773 = vmatpush.msrb.mxu0 %v267_v13  ;;  %v364_v11 = vld [vmem:[#allocation2 + $0x910] sm:$0xff]  ;;  %v381_v12 = vld [vmem:[#allocation2 + $0x998] sm:$0xff]  ;;  %v331_v13 = vld [vmem:[#allocation2 + $0x808] sm:$0xff] }
  0x92   :  { %793 = vmatpush.msrb.mxu1 %v283_v14  ;;  %813 = vmatpush.msrb.mxu2 %v299_v15  ;;  %v347_v14 = vld [vmem:[#allocation2 + $0x888] sm:$0xff] }
  0x93   :  { %832 = vmatpush.msrb.mxu3 %v316_v16  ;;  %774 = vmatpush.msrb.mxu0 %v266_v17  ;;  %v363_v15 = vld [vmem:[#allocation2 + $0x908] sm:$0xff]  ;;  %v380_v16 = vld [vmem:[#allocation2 + $0x990] sm:$0xff]  ;;  %v330_v17 = vld [vmem:[#allocation2 + $0x800] sm:$0xff] }
  0x94   :  { %794 = vmatpush.msrb.mxu1 %v282_v18  ;;  %814 = vmatpush.msrb.mxu2 %v298_v19  ;;  %v346_v18 = vld [vmem:[#allocation2 + $0x880] sm:$0xff] }
  0x95   :  { %833 = vmatpush.msrb.mxu3 %v315_v20  ;;  %775 = vmatmul.f32.vlgmr.msrb.gmra.mxu0 %v1346_v26  ;;  %v392_v26 = vld [vmem:[#allocation2 + $0x9f0] sm:$0xff]  ;;  %v362_v19 = vld [vmem:[#allocation2 + $0x900] sm:$0xff]  ;;  %v379_v20 = vld [vmem:[#allocation2 + $0x988] sm:$0xff] }
  0x96   :  { %815 = vmatmul.f32.vlgmr.msrb.gmra.mxu2 %v1348_v27  ;;  %839 = vmatpush.msra.mxu0 %v345_v21  ;;  %v342_v27 = vld [vmem:[#allocation2 + $0x860] sm:$0xff]  ;;  %v487_v21 = vld.sshfl [vmem:[#allocation1] sm:$0xff pattern:$0x73625140] }
  0x97   :  { %859 = vmatpush.msra.mxu1 %v361_v22  ;;  %879 = vmatpush.msra.mxu2 %v377_v23  ;;  %v489_v22 = vld.sshfl [vmem:[#allocation1 + $0x10] sm:$0xff pattern:$0x73625140]  ;;  %v409_v23 = vld [vmem:[#allocation2 + $0xa78] sm:$0xff] }
  0x98   :  { %834 = vmatpush.msrb.mxu3 %v314_v24  ;;  %795 = vmatmul.f32.vlgmr.msrb.gmra.mxu1 %v1350_v33  ;;  %v357_v33 = vld [vmem:[#allocation2 + $0x8d8] sm:$0xff] }
  0x99   :  { %835 = vmatmul.f32.vlgmr.msrb.gmra.mxu3 %v1355_v28  ;;  %840 = vmatpush.msra.mxu0 %v344_v25  ;;  %v373_v28 = vld [vmem:[#allocation2 + $0x958] sm:$0xff] }
  0x9a   :  { %860 = vmatpush.msra.mxu1 %v360_v29  ;;  %880 = vmatpush.msra.mxu2 %v376_v30  ;;  %v425_v24 = vld [vmem:[#allocation2 + $0xaf8] sm:$0xff]  ;;  %v378_v29 = vld [vmem:[#allocation2 + $0x980] sm:$0xff] }
  0x9b   :  { %899 = vmatpush.msra.mxu3 %v393_v32  ;;  %841 = vmatpush.msra.mxu0 %v343_v34  ;;  %v441_v25 = vld [vmem:[#allocation2 + $0xb78] sm:$0xff]  ;;  %v488_v30 = vld.sshfl [vmem:[#allocation1 + $0x8] sm:$0xff pattern:$0x73625140]  ;;  %v408_v34 = vld [vmem:[#allocation2 + $0xa70] sm:$0xff] }
  0x9c   :  { %861 = vmatpush.msra.mxu1 %v359_v35  ;;  %881 = vmatpush.msra.mxu2 %v375_v31  ;;  %v490_v32 = vld.sshfl [vmem:[#allocation1 + $0x18] sm:$0xff pattern:$0x73625140] }
  0x9d   :  { %900 = vmatpush.msra.mxu3 %v392_v26  ;;  %842 = vmatpush.msra.mxu0 %v342_v27  ;;  %v424_v35 = vld [vmem:[#allocation2 + $0xaf0] sm:$0xff]  ;;  %v457_v26 = vld [vmem:[#allocation2 + $0xbf8] sm:$0xff]  ;;  %v407_v27 = vld [vmem:[#allocation2 + $0xa68] sm:$0xff] }
  0x9e   :  { %862 = vmatpush.msra.mxu1 %v358_v36  ;;  %882 = vmatpush.msra.mxu2 %v374_v37  ;;  %v440_v31 = vld [vmem:[#allocation2 + $0xb70] sm:$0xff]  ;;  %v423_v36 = vld [vmem:[#allocation2 + $0xae8] sm:$0xff] }
  0x9f   :  { %901 = vmatpush.msra.mxu3 %v391_v38  ;;  %843 = vmatpush.msra.mxu0 %v341_v39  ;;  %v439_v37 = vld [vmem:[#allocation2 + $0xb68] sm:$0xff]  ;;  %v456_v38 = vld [vmem:[#allocation2 + $0xbf0] sm:$0xff]  ;;  %v406_v39 = vld [vmem:[#allocation2 + $0xa60] sm:$0xff] }
  0xa0   :  { %863 = vmatpush.msra.mxu1 %v357_v33  ;;  %883 = vmatpush.msra.mxu2 %v373_v28  ;;  %v422_v33 = vld [vmem:[#allocation2 + $0xae0] sm:$0xff] }
  0xa1   :  { %902 = vmatpush.msra.mxu3 %v390_v40  ;;  %844 = vmatpush.msra.mxu0 %v340_v41  ;;  %v438_v28 = vld [vmem:[#allocation2 + $0xb60] sm:$0xff]  ;;  %v455_v40 = vld [vmem:[#allocation2 + $0xbe8] sm:$0xff]  ;;  %v405_v41 = vld [vmem:[#allocation2 + $0xa58] sm:$0xff] }
  0xa2   :  { %864 = vmatpush.msra.mxu1 %v356_v42  ;;  %884 = vmatpush.msra.mxu2 %v372_v43  ;;  %v421_v42 = vld [vmem:[#allocation2 + $0xad8] sm:$0xff] }
  0xa3   :  { %903 = vmatpush.msra.mxu3 %v389_v44  ;;  %845 = vmatpush.msra.mxu0 %v339_v45  ;;  %v437_v43 = vld [vmem:[#allocation2 + $0xb58] sm:$0xff]  ;;  %v454_v44 = vld [vmem:[#allocation2 + $0xbe0] sm:$0xff]  ;;  %v404_v45 = vld [vmem:[#allocation2 + $0xa50] sm:$0xff] }
  0xa4   :  { %865 = vmatpush.msra.mxu1 %v355_v46  ;;  %885 = vmatpush.msra.mxu2 %v371_v47  ;;  %v420_v46 = vld [vmem:[#allocation2 + $0xad0] sm:$0xff] }
  0xa5   :  { %904 = vmatpush.msra.mxu3 %v388_v48  ;;  %846 = vmatpush.msra.mxu0 %v338_v49  ;;  %v436_v47 = vld [vmem:[#allocation2 + $0xb50] sm:$0xff]  ;;  %v453_v48 = vld [vmem:[#allocation2 + $0xbd8] sm:$0xff]  ;;  %v403_v49 = vld [vmem:[#allocation2 + $0xa48] sm:$0xff] }
  0xa6   :  { %866 = vmatpush.msra.mxu1 %v354_v50  ;;  %886 = vmatpush.msra.mxu2 %v370_v51  ;;  %v419_v50 = vld [vmem:[#allocation2 + $0xac8] sm:$0xff] }
  0xa7   :  { %905 = vmatpush.msra.mxu3 %v387_v52  ;;  %847 = vmatpush.msra.mxu0 %v337_v53  ;;  %v435_v51 = vld [vmem:[#allocation2 + $0xb48] sm:$0xff]  ;;  %v452_v52 = vld [vmem:[#allocation2 + $0xbd0] sm:$0xff]  ;;  %v402_v53 = vld [vmem:[#allocation2 + $0xa40] sm:$0xff] }
  0xa8   :  { %867 = vmatpush.msra.mxu1 %v353_v54  ;;  %887 = vmatpush.msra.mxu2 %v369_v55  ;;  %v418_v54 = vld [vmem:[#allocation2 + $0xac0] sm:$0xff] }
  0xa9   :  { %906 = vmatpush.msra.mxu3 %v386_v56  ;;  %848 = vmatpush.msra.mxu0 %v336_v57  ;;  %v434_v55 = vld [vmem:[#allocation2 + $0xb40] sm:$0xff]  ;;  %v451_v56 = vld [vmem:[#allocation2 + $0xbc8] sm:$0xff]  ;;  %v401_v57 = vld [vmem:[#allocation2 + $0xa38] sm:$0xff] }
  0xaa   :  { %868 = vmatpush.msra.mxu1 %v352_v58  ;;  %888 = vmatpush.msra.mxu2 %v368_v59  ;;  %v417_v58 = vld [vmem:[#allocation2 + $0xab8] sm:$0xff] }
  0xab   :  { %907 = vmatpush.msra.mxu3 %v385_v60  ;;  %849 = vmatpush.msra.mxu0 %v335_v61  ;;  %v433_v59 = vld [vmem:[#allocation2 + $0xb38] sm:$0xff]  ;;  %v450_v60 = vld [vmem:[#allocation2 + $0xbc0] sm:$0xff]  ;;  %v400_v61 = vld [vmem:[#allocation2 + $0xa30] sm:$0xff] }
  0xac   :  { %869 = vmatpush.msra.mxu1 %v351_v62  ;;  %889 = vmatpush.msra.mxu2 %v367_v63  ;;  %v416_v62 = vld [vmem:[#allocation2 + $0xab0] sm:$0xff] }
  0xad   :  { %908 = vmatpush.msra.mxu3 %v384_v0  ;;  %850 = vmatpush.msra.mxu0 %v334_v1  ;;  %v432_v63 = vld [vmem:[#allocation2 + $0xb30] sm:$0xff]  ;;  %v449_v0 = vld [vmem:[#allocation2 + $0xbb8] sm:$0xff]  ;;  %v399_v1 = vld [vmem:[#allocation2 + $0xa28] sm:$0xff] }
  0xae   :  { %870 = vmatpush.msra.mxu1 %v350_v2  ;;  %890 = vmatpush.msra.mxu2 %v366_v3  ;;  %v415_v2 = vld [vmem:[#allocation2 + $0xaa8] sm:$0xff] }
  0xaf   :  { %909 = vmatpush.msra.mxu3 %v383_v4  ;;  %851 = vmatpush.msra.mxu0 %v333_v5  ;;  %v431_v3 = vld [vmem:[#allocation2 + $0xb28] sm:$0xff]  ;;  %v448_v4 = vld [vmem:[#allocation2 + $0xbb0] sm:$0xff]  ;;  %v398_v5 = vld [vmem:[#allocation2 + $0xa20] sm:$0xff] }
  0xb0   :  { %871 = vmatpush.msra.mxu1 %v349_v6  ;;  %891 = vmatpush.msra.mxu2 %v365_v7  ;;  %v414_v6 = vld [vmem:[#allocation2 + $0xaa0] sm:$0xff] }
  0xb1   :  { %910 = vmatpush.msra.mxu3 %v382_v8  ;;  %852 = vmatpush.msra.mxu0 %v332_v9  ;;  %v430_v7 = vld [vmem:[#allocation2 + $0xb20] sm:$0xff]  ;;  %v447_v8 = vld [vmem:[#allocation2 + $0xba8] sm:$0xff]  ;;  %v397_v9 = vld [vmem:[#allocation2 + $0xa18] sm:$0xff] }
  0xb2   :  { %872 = vmatpush.msra.mxu1 %v348_v10  ;;  %892 = vmatpush.msra.mxu2 %v364_v11  ;;  %v413_v10 = vld [vmem:[#allocation2 + $0xa98] sm:$0xff] }
  0xb3   :  { %911 = vmatpush.msra.mxu3 %v381_v12  ;;  %853 = vmatpush.msra.mxu0 %v331_v13  ;;  %v429_v11 = vld [vmem:[#allocation2 + $0xb18] sm:$0xff]  ;;  %v446_v12 = vld [vmem:[#allocation2 + $0xba0] sm:$0xff]  ;;  %v396_v13 = vld [vmem:[#allocation2 + $0xa10] sm:$0xff] }
  0xb4   :  { %873 = vmatpush.msra.mxu1 %v347_v14  ;;  %893 = vmatpush.msra.mxu2 %v363_v15  ;;  %v412_v14 = vld [vmem:[#allocation2 + $0xa90] sm:$0xff] }
  0xb5   :  { %912 = vmatpush.msra.mxu3 %v380_v16  ;;  %854 = vmatpush.msra.mxu0 %v330_v17  ;;  %v428_v15 = vld [vmem:[#allocation2 + $0xb10] sm:$0xff]  ;;  %v445_v16 = vld [vmem:[#allocation2 + $0xb98] sm:$0xff]  ;;  %v395_v17 = vld [vmem:[#allocation2 + $0xa08] sm:$0xff] }
  0xb6   :  { %874 = vmatpush.msra.mxu1 %v346_v18  ;;  %894 = vmatpush.msra.mxu2 %v362_v19  ;;  %v411_v18 = vld [vmem:[#allocation2 + $0xa88] sm:$0xff] }
  0xb7   :  { %913 = vmatpush.msra.mxu3 %v379_v20  ;;  %855 = vmatmul.f32.vlgmr.msra.gmra.mxu0 %v487_v21  ;;  %v427_v19 = vld [vmem:[#allocation2 + $0xb08] sm:$0xff]  ;;  %v444_v20 = vld [vmem:[#allocation2 + $0xb90] sm:$0xff]  ;;  %v394_v21 = vld [vmem:[#allocation2 + $0xa00] sm:$0xff] }
  0xb8   :  { %895 = vmatmul.f32.vlgmr.msra.gmra.mxu2 %v489_v22  ;;  %919 = vmatpush.msrb.mxu0 %v409_v23  ;;  %v410_v22 = vld [vmem:[#allocation2 + $0xa80] sm:$0xff] }
  0xb9   :  { %939 = vmatpush.msrb.mxu1 %v425_v24  ;;  %959 = vmatpush.msrb.mxu2 %v441_v25  ;;  %v426_v23 = vld [vmem:[#allocation2 + $0xb00] sm:$0xff]  ;;  %v443_v24 = vld [vmem:[#allocation2 + $0xb88] sm:$0xff]  ;;  %v491_v25 = vld.sshfl [vmem:[#allocation1 + $0x20] sm:$0xff pattern:$0x73625140] }
  0xba   :  { %914 = vmatpush.msra.mxu3 %v378_v29  ;;  %875 = vmatmul.f32.vlgmr.msra.gmra.mxu1 %v488_v30  ;;  %v493_v29 = vld.sshfl [vmem:[#allocation1 + $0x30] sm:$0xff pattern:$0x73625140]  ;;  %v1043_v30 = vld [vmem:[#allocation7 + $0x38] sm:$0xff] }
  0xbb   :  { %915 = vmatmul.f32.vlgmr.msra.gmra.mxu3 %v490_v32  ;;  %920 = vmatpush.msrb.mxu0 %v408_v34  ;;  %v442_v32 = vld [vmem:[#allocation2 + $0xb80] sm:$0xff] }
  0xbc   :  { %940 = vmatpush.msrb.mxu1 %v424_v35  ;;  %960 = vmatpush.msrb.mxu2 %v440_v31  ;;  %v492_v34 = vld.sshfl [vmem:[#allocation1 + $0x28] sm:$0xff pattern:$0x73625140]  ;;  %v494_v35 = vld.sshfl [vmem:[#allocation1 + $0x38] sm:$0xff pattern:$0x73625140] }
  0xbd   :  { %979 = vmatpush.msrb.mxu3 %v457_v26  ;;  %921 = vmatpush.msrb.mxu0 %v407_v27  ;;  %v1042_v31 = vld [vmem:[#allocation7 + $0x30] sm:$0xff]  ;;  %v1041_v26 = vld [vmem:[#allocation7 + $0x28] sm:$0xff]  ;;  %v1040_v27 = vld [vmem:[#allocation7 + $0x20] sm:$0xff] }
  0xbe   :  { %941 = vmatpush.msrb.mxu1 %v423_v36  ;;  %961 = vmatpush.msrb.mxu2 %v439_v37  ;;  %v1039_v36 = vld [vmem:[#allocation7 + $0x18] sm:$0xff]  ;;  %v1038_v37 = vld [vmem:[#allocation7 + $0x10] sm:$0xff] }
  0xbf   :  { %980 = vmatpush.msrb.mxu3 %v456_v38  ;;  %922 = vmatpush.msrb.mxu0 %v406_v39  ;;  %v1037_v38 = vld [vmem:[#allocation7 + $0x8] sm:$0xff]  ;;  %v1036_v39 = vld [vmem:[#allocation7] sm:$0xff] }
  0xc0   :  { %942 = vmatpush.msrb.mxu1 %v422_v33  ;;  %962 = vmatpush.msrb.mxu2 %v438_v28  ;;  %v1035_v33 = vld [vmem:[%s1370_s3] sm:$0x3]  ;;  %s1258_s3 = smov [#allocation8]  }
  0xc1   :  { %981 = vmatpush.msrb.mxu3 %v455_v40  ;;  %923 = vmatpush.msrb.mxu0 %v405_v41  ;;  %s1127_s20 = sshll.u32 %s1258_s3, 4  ;;  %s1128_s20 = int_to_ptr.vmem [resolvable:$true] %s1127_s20 }
  0xc2   :  { %943 = vmatpush.msrb.mxu1 %v421_v42  ;;  %963 = vmatpush.msrb.mxu2 %v437_v43 }
  0xc3   :  { %982 = vmatpush.msrb.mxu3 %v454_v44  ;;  %924 = vmatpush.msrb.mxu0 %v404_v45  ;;  %v1014_v45 = vld [vmem:[#allocation5 + $0x78] sm:$0xff] }
  0xc4   :  { %944 = vmatpush.msrb.mxu1 %v420_v46  ;;  %964 = vmatpush.msrb.mxu2 %v436_v47  ;;  %v1013_v46 = vld [vmem:[#allocation5 + $0x70] sm:$0xff]  ;;  %v1012_v47 = vld [vmem:[#allocation5 + $0x68] sm:$0xff] }
  0xc5   :  { %983 = vmatpush.msrb.mxu3 %v453_v48  ;;  %925 = vmatpush.msrb.mxu0 %v403_v49 }
  0xc6   :  { %945 = vmatpush.msrb.mxu1 %v419_v50  ;;  %965 = vmatpush.msrb.mxu2 %v435_v51  ;;  %v1011_v50 = vld [vmem:[#allocation5 + $0x60] sm:$0xff]  ;;  %v1010_v51 = vld [vmem:[#allocation5 + $0x58] sm:$0xff] }
  0xc7   :  { %984 = vmatpush.msrb.mxu3 %v452_v52  ;;  %926 = vmatpush.msrb.mxu0 %v402_v53 }
  0xc8   :  { %946 = vmatpush.msrb.mxu1 %v418_v54  ;;  %966 = vmatpush.msrb.mxu2 %v434_v55  ;;  %v1009_v54 = vld [vmem:[#allocation5 + $0x50] sm:$0xff]  ;;  %v1008_v55 = vld [vmem:[#allocation5 + $0x48] sm:$0xff] }
  0xc9   :  { %985 = vmatpush.msrb.mxu3 %v451_v56  ;;  %927 = vmatpush.msrb.mxu0 %v401_v57 }
  0xca   :  { %947 = vmatpush.msrb.mxu1 %v417_v58  ;;  %967 = vmatpush.msrb.mxu2 %v433_v59  ;;  %v1007_v58 = vld [vmem:[#allocation5 + $0x40] sm:$0xff]  ;;  %v1006_v59 = vld [vmem:[#allocation5 + $0x38] sm:$0xff] }
  0xcb   :  { %986 = vmatpush.msrb.mxu3 %v450_v60  ;;  %928 = vmatpush.msrb.mxu0 %v400_v61 }
  0xcc   :  { %948 = vmatpush.msrb.mxu1 %v416_v62  ;;  %968 = vmatpush.msrb.mxu2 %v432_v63  ;;  %v1005_v62 = vld [vmem:[#allocation5 + $0x30] sm:$0xff] }
  0xcd   :  { %987 = vmatpush.msrb.mxu3 %v449_v0  ;;  %929 = vmatpush.msrb.mxu0 %v399_v1  ;;  %v556_v28 = vpop.f32.mrf.mxu1  ;;  %v536_v40 = vpop.f32.mrf.mxu0 }
  0xce   :  { %949 = vmatpush.msrb.mxu1 %v415_v2  ;;  %969 = vmatpush.msrb.mxu2 %v431_v3  ;;  %v557_v41 = vadd.f32 %v556_v28, %v536_v40 }
  0xcf   :  { %988 = vmatpush.msrb.mxu3 %v448_v4  ;;  %930 = vmatpush.msrb.mxu0 %v398_v5  ;;  %v1004_v4 = vld [vmem:[#allocation5 + $0x28] sm:$0xff] }
  0xd0   :  { %950 = vmatpush.msrb.mxu1 %v414_v6  ;;  %970 = vmatpush.msrb.mxu2 %v430_v7  ;;  %v1003_v6 = vld [vmem:[#allocation5 + $0x20] sm:$0xff] }
  0xd1   :  { %989 = vmatpush.msrb.mxu3 %v447_v8  ;;  %931 = vmatpush.msrb.mxu0 %v397_v9  ;;  %v576_v42 = vpop.f32.mrf.mxu2  ;;  %v1002_v8 = vld [vmem:[#allocation5 + $0x18] sm:$0xff] }
  0xd2   :  { %951 = vmatpush.msrb.mxu1 %v413_v10  ;;  %971 = vmatpush.msrb.mxu2 %v429_v11  ;;  %v577_v43 = vadd.f32 %v576_v42, %v557_v41  ;;  %v1001_v11 = vld [vmem:[#allocation5 + $0x10] sm:$0xff] }
  0xd3   :  { %990 = vmatpush.msrb.mxu3 %v446_v12  ;;  %932 = vmatpush.msrb.mxu0 %v396_v13  ;;  %v1000_v13 = vld [vmem:[#allocation5 + $0x8] sm:$0xff] }
  0xd4   :  { %952 = vmatpush.msrb.mxu1 %v412_v14  ;;  %972 = vmatpush.msrb.mxu2 %v428_v15  ;;  %v596_v44 = vpop.f32.mrf.mxu3  ;;  %v999_v15 = vld [vmem:[#allocation5] sm:$0xff] }
  0xd5   :  { %991 = vmatpush.msrb.mxu3 %v445_v16  ;;  %933 = vmatpush.msrb.mxu0 %v395_v17  ;;  %v597_v48 = vadd.f32 %v596_v44, %v577_v43 }
  0xd6   :  { %953 = vmatpush.msrb.mxu1 %v411_v18  ;;  %973 = vmatpush.msrb.mxu2 %v427_v19 }
  0xd7   :  { %992 = vmatpush.msrb.mxu3 %v444_v20  ;;  %934 = vmatpush.msrb.mxu0 %v394_v21  ;;  %v616_v49 = vpop.f32.mrf.mxu0 }
  0xd8   :  { %954 = vmatpush.msrb.mxu1 %v410_v22  ;;  %974 = vmatpush.msrb.mxu2 %v426_v23  ;;  %v617_v52 = vadd.f32 %v616_v49, %v597_v48 }
  0xd9   :  { %993 = vmatpush.msrb.mxu3 %v443_v24  ;;  %935 = vmatmul.f32.vlgmr.msrb.gmra.mxu0 %v491_v25 }
  0xda   :  { %975 = vmatmul.f32.vlgmr.msrb.gmra.mxu2 %v493_v29  ;;  %1056 = vmatpush.msra.mxu1 %v1043_v30  ;;  %v636_v53 = vpop.f32.mrf.mxu1  ;;  %v656_v57 = vpop.f32.mrf.mxu2 }
  0xdb   :  { %994 = vmatpush.msrb.mxu3 %v442_v32  ;;  %955 = vmatmul.f32.vlgmr.msrb.gmra.mxu1 %v492_v34  ;;  %v637_v56 = vadd.f32 %v636_v53, %v617_v52 }
  0xdc   :  { %995 = vmatmul.f32.vlgmr.msrb.gmra.mxu3 %v494_v35  ;;  %1057 = vmatpush.msra.mxu1 %v1042_v31 }
  0xdd   :  { %1015 = vmatpush.msra.mxu0 %v1014_v45  ;;  %v657_v60 = vadd.f32 %v656_v57, %v637_v56  ;;  %v676_v61 = vpop.f32.mrf.mxu3 }
  0xde   :  { %1058 = vmatpush.msra.mxu1 %v1041_v26 }
  0xdf   :  { %1016 = vmatpush.msra.mxu0 %v1013_v46  ;;  %v677_v0 = vadd.f32 %v676_v61, %v657_v60 }
  0xe0   :  { %1059 = vmatpush.msra.mxu1 %v1040_v27 }
  0xe1   :  { %1017 = vmatpush.msra.mxu0 %v1012_v47 }
  0xe2   :  { %1060 = vmatpush.msra.mxu1 %v1039_v36 }
  0xe3   :  { %1018 = vmatpush.msra.mxu0 %v1011_v50 }
  0xe4   :  { %1061 = vmatpush.msra.mxu1 %v1038_v37 }
  0xe5   :  { %1019 = vmatpush.msra.mxu0 %v1010_v51 }
  0xe6   :  { %1062 = vmatpush.msra.mxu1 %v1037_v38 }
  0xe7   :  { %1020 = vmatpush.msra.mxu0 %v1009_v54 }
  0xe8   :  { %1063 = vmatpush.msra.mxu1 %v1036_v39 }
  0xe9   :  { %1140 = vmatmul.msk.f32.vlgmr.msra.gmra.mxu1 %vm1044_vm0, %v1035_v33  ;;  %1021 = vmatpush.msra.mxu0 %v1008_v55 }
  0xeb   :  { %1022 = vmatpush.msra.mxu0 %v1007_v58 }
  0xed   :  { %1023 = vmatpush.msra.mxu0 %v1006_v59 }
  0xef   :  { %1024 = vmatpush.msra.mxu0 %v1005_v62 }
  0xf0   :  { %v696_v63 = vpop.f32.mrf.mxu0 }
  0xf1   :  { %v697_v1 = vadd.f32 %v696_v63, %v677_v0  ;;  %1025 = vmatpush.msra.mxu0 %v1004_v4 }
  0xf3   :  { %v716_v2 = vpop.f32.mrf.mxu1  ;;  %1026 = vmatpush.msra.mxu0 %v1003_v6 }
  0xf4   :  { %v717_v5 = vadd.f32 %v716_v2, %v697_v1 }
  0xf5   :  { %1027 = vmatpush.msra.mxu0 %v1002_v8 }
  0xf7   :  { %v736_v3 = vpop.f32.mrf.mxu2  ;;  %1028 = vmatpush.msra.mxu0 %v1001_v11 }
  0xf8   :  { %v737_v7 = vadd.f32 %v736_v3, %v717_v5 }
  0xf9   :  { %1029 = vmatpush.msra.mxu0 %v1000_v13 }
  0xfa   :  { %v756_v9 = vpop.f32.mrf.mxu3 }
  0xfb   :  { %v757_v12 = vadd.f32 %v756_v9, %v737_v7  ;;  %1030 = vmatpush.msra.mxu0 %v999_v15 }
 0x112   :  { %v776_v10 = vpop.f32.mrf.mxu0 }
 0x113   :  { %v777_v14 = vadd.f32 %v776_v10, %v757_v12 }
 0x115   :  { %v796_v16 = vpop.f32.mrf.mxu1 }
 0x116   :  { %v797_v18 = vadd.f32 %v796_v16, %v777_v14 }
 0x119   :  { %v816_v17 = vpop.f32.mrf.mxu2 }
 0x11a   :  { %v817_v19 = vadd.f32 %v816_v17, %v797_v18 }
 0x11c   :  { %v836_v20 = vpop.f32.mrf.mxu3 }
 0x11d   :  { %v837_v22 = vadd.f32 %v836_v20, %v817_v19 }
 0x134   :  { %v856_v21 = vpop.f32.mrf.mxu0 }
 0x135   :  { %v857_v23 = vadd.f32 %v856_v21, %v837_v22 }
 0x137   :  { %v876_v24 = vpop.f32.mrf.mxu1 }
 0x138   :  { %v877_v29 = vadd.f32 %v876_v24, %v857_v23 }
 0x13b   :  { %v896_v25 = vpop.f32.mrf.mxu2 }
 0x13c   :  { %v897_v30 = vadd.f32 %v896_v25, %v877_v29 }
 0x13e   :  { %v916_v32 = vpop.f32.mrf.mxu3 }
 0x13f   :  { %v917_v34 = vadd.f32 %v916_v32, %v897_v30 }
 0x156   :  { %v936_v35 = vpop.f32.mrf.mxu0 }
 0x157   :  { %v937_v31 = vadd.f32 %v936_v35, %v917_v34 }
 0x158   :  { %v956_v26 = vpop.f32.mrf.mxu1 }
 0x159   :  { %v957_v27 = vadd.f32 %v956_v26, %v937_v31 }
 0x15d   :  { %v976_v36 = vpop.f32.mrf.mxu2 }
 0x15e   :  { %v977_v37 = vadd.f32 %v976_v36, %v957_v27 }
 0x15f   :  { %v996_v38 = vpop.f32.mrf.mxu3 }
 0x160   :  { %v997_v39 = vadd.f32 %v996_v38, %v977_v37 }
 0x162   :  { %1031 = vmatmul.f32.vlgmr.msra.gmra.mxu0 %v997_v39 }
 0x166   :  { %v1065_v33 = vpop.f32.mrf.mxu1 }
 0x167   :  { %v1084_v28 = vmul.f32 %v1065_v33, %v1065_v33 }
 0x169   :  { %v1085_v40 = vsel %vm1069_vm1, %v1084_v28, 0.0 }
 0x16a   :  { %1086 = vadd.xlane.f32.xlu0 %v1085_v40 }
 0x1dd   :  { %v1087_v41 = vpop.xlane.xlu0 %1086 }
 0x1de   :  { %1147 = vrsqrt.f32 %v1087_v41  ;;  %vm1094_vm2 = vweird.f32 %v1087_v41 }
 0x1df   :  { %v1032_v42 = vpop.f32.mrf.mxu0 }
 0x1e0   :  { %v1068_v43 = vmul.f32 %v1032_v42, %v1032_v42 }
 0x1e2   :  { %v1070_v44 = vsel %vm1069_vm1, %v1068_v43, 0.0 }
 0x1e3   :  { %1071 = vadd.xlane.f32.xlu0 %v1070_v44 }
 0x1e4   :  { %v1148_v45 = vpop.eup %1147 }
 0x1e5   :  { %v1089_v46 = vmul.f32 %v1148_v45, %v1087_v41  ;;  %vm1095_vm3 = vweird.f32 %v1148_v45 }
 0x1e6   :  { %vm1096_vm4 = vmor %vm1094_vm2, %vm1095_vm3 }
 0x1e7   :  { %v1090_v47 = vmul.f32 %v1148_v45, %v1089_v46 }
 0x1e9   :  { %v1091_v48 = vmul.f32 0.5, %v1090_v47 }
 0x1eb   :  { %v1092_v49 = vsub.f32 1.5, %v1091_v48 }
 0x1ed   :  { %v1093_v50 = vmul.f32 %v1148_v45, %v1092_v49 }
 0x1ef   :  { %v1097_v51 = vsel %vm1096_vm4, %v1148_v45, %v1093_v50 }
 0x1f0   :  { %v1098_v52 = vmul.f32 %v1097_v51, %v1065_v33 }
 0x1f2   :  { %1114 = vmatpush.xpose.msra.mxu2 %v1098_v52 }
 0x256   :  { %v1072_v53 = vpop.xlane.xlu0 %1071 }
 0x257   :  { %1149 = vrsqrt.f32 %v1072_v53  ;;  %vm1079_vm6 = vweird.f32 %v1072_v53 }
 0x25d   :  { %v1150_v54 = vpop.eup %1149 }
 0x25e   :  { %v1074_v55 = vmul.f32 %v1150_v54, %v1072_v53  ;;  %vm1080_vm5 = vweird.f32 %v1150_v54 }
 0x25f   :  { %vm1081_vm7 = vmor %vm1079_vm6, %vm1080_vm5 }
 0x260   :  { %v1075_v56 = vmul.f32 %v1150_v54, %v1074_v55 }
 0x262   :  { %v1076_v57 = vmul.f32 0.5, %v1075_v56 }
 0x264   :  { %v1077_v58 = vsub.f32 1.5, %v1076_v57 }
 0x266   :  { %v1078_v59 = vmul.f32 %v1150_v54, %v1077_v58 }
 0x268   :  { %v1082_v60 = vsel %vm1081_vm7, %v1150_v54, %v1078_v59 }
 0x269   :  { %v1083_v61 = vmul.f32 %v1082_v60, %v1032_v42 }
 0x26b   :  { %1115 = vmatmul.f32.vlgmr.msra.gmra.mxu2 %v1083_v61 }
 0x2ee   :  { %v1116_v62 = vpop.f32.mrf.mxu2 }
 0x2ef   :  { %v1119_v63 = vsub.f32 1.0, %v1116_v62 }
 0x2f1   :  { %1121 = vst.msk [vmem:[#allocation8] sm:$0x3] %vm1120_vm8, %v1119_v63 }
 0x2f2   :  { %1132 = dma.vmem_to_hbm [thread:$0]  %s1128_s20, 32, %s1130_s23, [#allocation4]  }
 0x2f3   :  { %1251 = dma.done.wait [#allocation4], 32  }
 0x2f4   :  { %1252 = vsyncadd [#allocation4], 4294967264 }
 0x2f5   :  { %1137 = vsyncpa [#allocation3], 1 }
 0x2f6   :  { %1138 = vsyncpa [#allocation6], 1 }
 0x2f7   :  { %1139 = vsyncpa [#allocation4], 1 }

</bundles_post_ra>
